<compile_context>
chip_gen: v7x
topology: tpu7x:2x2x1
jax: 0.10.0
libtpu: 0.0.40
codegen_flags: <defaults>
</compile_context>

<pallas_src>
import functools
import math

import jax
import jax.numpy as jnp
from jax.experimental import pallas as pl
from jax.experimental.pallas import tpu as pltpu


# ----------------------------------------------------------------------------
# Fused decoder kernel: all layers for one batch tile.
#   per layer:  U   = x @ Wx_perm + h @ Wh_perm          (one wide MXU dot each)
#               z   = sum_k S_k @ U[..., k-chunk] + b    (graph conv, f32 acc)
#               i,f,o = sigmoid(z[:, :3D]); g = tanh(z[:, 3D:])
#               c_new = f*c + i*g ; h_new = o*tanh(c_new)
# ----------------------------------------------------------------------------
def _decoder_kernel(*refs, num_layers, node, tb, hidden, k2):
    x_ref, sup_ref = refs[0], refs[1]
    layer_refs = refs[2:2 + 5 * num_layers]          # (h, c, wx, wh, b) per layer
    out_refs = refs[2 + 5 * num_layers:]             # (h_out, c_out) per layer

    N, TB, D = node, tb, hidden
    G = 4 * D

    # Hoist the batch broadcast of the (tiny) supports out of the layer/k loops.
    sup_b = [jnp.broadcast_to(sup_ref[k][None], (TB, N, N)) for k in range(k2)]

    cur = x_ref[...]                                 # (TB, N, cin0), bf16
    for l in range(num_layers):
        h_ref, c_ref, wx_ref, wh_ref, b_ref = layer_refs[5 * l: 5 * l + 5]

        x2 = cur.reshape(TB * N, cur.shape[-1])      # (TB*N, cin) bf16
        h2 = h_ref[...].reshape(TB * N, D)           # (TB*N, D)   bf16

        # Matmul-first gate projection: (TB*N, cin)@(cin, K2*4D) + (TB*N, D)@(D, K2*4D).
        # f32 MXU accumulation, keep the U slab bf16 (halves VMEM / vld-vst traffic).
        u = (jnp.dot(x2, wx_ref[...], preferred_element_type=jnp.float32)
             + jnp.dot(h2, wh_ref[...], preferred_element_type=jnp.float32))
        u = u.astype(jnp.bfloat16).reshape(TB, N, k2 * G)

        # Apply the Chebyshev supports: z = sum_k S_k @ U_k, f32 accumulation.
        # Lane slices are at multiples of 4D (=128 for D=32 -> aligned).
        z = None
        for k in range(k2):
            part = jnp.einsum('tnm,tmo->tno', sup_b[k],
                              u[:, :, k * G:(k + 1) * G],
                              preferred_element_type=jnp.float32)   # (TB, N, 4D)
            z = part if z is None else z + part

        z2 = z.reshape(TB * N, G) + b_ref[0]          # bias broadcast, f32

        # Gate nonlinearities in f32 (v5e has no bf16 VPU/EUP).
        ifo = jax.nn.sigmoid(z2[:, :3 * D])
        g_t = jnp.tanh(z2[:, 3 * D:])
        i_t = ifo[:, :D]
        f_t = ifo[:, D:2 * D]
        o_t = ifo[:, 2 * D:]

        c_old = c_ref[...].reshape(TB * N, D)         # f32
        c_new = f_t * c_old + i_t * g_t
        h_new = o_t * jnp.tanh(c_new)

        # Separate h / c outputs per layer: no packed slab + wrapper re-slice pass.
        out_refs[2 * l][...] = h_new.reshape(TB, N, D).astype(out_refs[2 * l].dtype)
        out_refs[2 * l + 1][...] = c_new.reshape(TB, N, D).astype(out_refs[2 * l + 1].dtype)

        cur = h_new.reshape(TB, N, D).astype(jnp.bfloat16)   # feed next layer


# ----------------------------------------------------------------------------
# Tile selection / VMEM budgeting
# ----------------------------------------------------------------------------
def _vmem_bytes_estimate(tb, node, cin0, hidden, num_layers, k2):
    D, N, G = hidden, node, 4 * hidden
    rows = tb * N
    cins = [cin0] + [D] * (num_layers - 1)
    total = 0
    # Resident operands (conservatively counted with the default double buffer).
    total += 2 * k2 * N * N * 2                                  # supports bf16
    for cin in cins:
        total += 2 * ((cin + D) * k2 * G * 2)                    # wx + wh bf16
        total += 2 * (8 * 128 * 4)                               # bias (padded)
    # Streamed per-tile blocks (double buffered).
    total += 2 * rows * cin0 * 2                                 # x bf16
    total += 2 * num_layers * rows * D * (2 + 4)                 # h bf16 + c f32
    total += 2 * num_layers * rows * D * (4 + 4)                 # h_out + c_out f32
    # In-kernel live intermediates (single buffered).
    total += rows * k2 * G * 2                                   # U bf16
    total += 4 * rows * G * 4                                    # z + gate slabs f32
    total += k2 * tb * N * N * 2                                 # broadcast supports
    return int(total * 1.25)                                     # fudge factor


def _pick_batch_tile(batch, node, cin0, hidden, num_layers, k2,
                     target_rows=1024, vmem_budget=48 << 20):
    """Largest batch tile dividing `batch` with ~target_rows gate-matmul rows,
    grid >= 2 steps when possible (v7x: both TensorCores), and within VMEM budget."""
    best = 1
    for tb in range(1, batch + 1):
        if batch % tb:
            continue
        if batch >= 2 and batch // tb < 2:
            continue                                   # keep both TCs busy on v7x
        if tb > 1 and tb * node > target_rows:
            continue
        if tb > 1 and _vmem_bytes_estimate(tb, node, cin0, hidden,
                                           num_layers, k2) > vmem_budget:
            continue
        best = tb
    return best


# ----------------------------------------------------------------------------
# Wrapper
# ----------------------------------------------------------------------------
def agcrnn_decoder_forward(xt, init_state, supports, params, cheb_k, hidden,
                           compute_dtype=jnp.bfloat16, batch_tile=None):
    """Matches AGCRNN_Decoder.forward: one time step through the fused layer stack."""
    B, N, cin0 = xt.shape
    D = hidden
    G = 4 * D
    L = len(params)

    sup = build_support_set(supports, cheb_k).astype(compute_dtype)   # (K2, N, N)
    K2 = sup.shape[0]

    TB = (batch_tile if batch_tile is not None
          else _pick_batch_tile(B, N, cin0, D, L, K2))
    assert B % TB == 0
    nb = B // TB

    inputs = [xt.astype(compute_dtype), sup]
    in_specs = [
        pl.BlockSpec((TB, N, cin0), lambda bi: (bi, 0, 0)),    # x
        pl.BlockSpec((K2, N, N), lambda bi: (0, 0, 0)),        # support stack (resident)
    ]

    cin = cin0
    for (w, b), (h, c) in zip(params, init_state):
        C = cin + D
        # Pre-permute W: (K2*C, 4D) -> (C, K2*4D); split into x-rows / h-rows so the
        # kernel never materializes [x, h] and the big dot is lane-dense (K2*4D wide).
        w_perm = w.reshape(K2, C, G).transpose(1, 0, 2).reshape(C, K2 * G)
        wx = w_perm[:cin].astype(compute_dtype)
        wh = w_perm[cin:].astype(compute_dtype)
        bb = b.reshape(1, G).astype(jnp.float32)

        inputs += [h.astype(compute_dtype),          # matmul operand -> bf16
                   c.astype(jnp.float32),            # cell state stays f32
                   wx, wh, bb]
        in_specs += [
            pl.BlockSpec((TB, N, D), lambda bi: (bi, 0, 0)),   # h
            pl.BlockSpec((TB, N, D), lambda bi: (bi, 0, 0)),   # c
            pl.BlockSpec(wx.shape, lambda bi: (0, 0)),         # Wx (resident)
            pl.BlockSpec(wh.shape, lambda bi: (0, 0)),         # Wh (resident)
            pl.BlockSpec(bb.shape, lambda bi: (0, 0)),         # bias (resident)
        ]
        cin = D

    out_shape = []
    out_specs = []
    for _ in range(L):
        out_shape += [jax.ShapeDtypeStruct((B, N, D), jnp.float32),   # h_new
                      jax.ShapeDtypeStruct((B, N, D), jnp.float32)]   # c_new
        out_specs += [pl.BlockSpec((TB, N, D), lambda bi: (bi, 0, 0)),
                      pl.BlockSpec((TB, N, D), lambda bi: (bi, 0, 0))]

    vmem_limit = min(max(_vmem_bytes_estimate(TB, N, cin0, D, L, K2), 32 << 20),
                     48 << 20)   # raise v5e's 16 MiB default; leave headroom on v7x

    kern = functools.partial(_decoder_kernel, num_layers=L, node=N, tb=TB,
                             hidden=D, k2=K2)

    outs = pl.pallas_call(
        kern,
        out_shape=tuple(out_shape),
        grid_spec=pltpu.PrefetchScalarGridSpec(
            num_scalar_prefetch=0,
            grid=(nb,),
            in_specs=in_specs,
            out_specs=out_specs),
        compiler_params=pltpu.CompilerParams(
            dimension_semantics=("parallel",),
            vmem_limit_bytes=vmem_limit),
    )(*inputs)
    if not isinstance(outs, (list, tuple)):
        outs = (outs,)

    output_hidden = [(outs[2 * l], outs[2 * l + 1]) for l in range(L)]
    return output_hidden[-1][0], output_hidden


# ----------------------------------------------------------------------------
# Plain-JAX glue
# ----------------------------------------------------------------------------
def build_support_set(supports, cheb_k):
    """Chebyshev polynomial support set, same ordering as the PyTorch AGCN."""
    assert cheb_k >= 2
    mats = []
    n = supports[0].shape[0]
    for a in supports:
        ks = [jnp.eye(n, dtype=a.dtype), a]
        for _ in range(2, cheb_k):
            ks.append(2.0 * a @ ks[-1] - ks[-2])
        mats.extend(ks)
    return jnp.stack(mats)  # (2*cheb_k, N, N)


def xavier_normal(key, shape):
    fan_in, fan_out = shape
    std = math.sqrt(2.0 / (fan_in + fan_out))
    return std * jax.random.normal(key, shape, dtype=jnp.float32)


def init_decoder_params(key, node_num, dim_in, dim_out, cheb_k, num_layers):
    """Per-layer gate-AGCN params.  (The `update` AGCN in the PyTorch cell is
    constructed but never used in forward(), so it is not materialized here.)"""
    params = []
    cin = dim_in
    for _ in range(num_layers):
        key, wk = jax.random.split(key)
        c = cin + dim_out
        w = xavier_normal(wk, (2 * cheb_k * c, 4 * dim_out))
        b = jnp.zeros((1, 4 * dim_out), jnp.float32)  # nn.init.constant_(bias, 0)
        params.append((w, b))
        cin = dim_out
    return params


# ----------------------------------------------------------------------------
# Pure-JAX f32 reference (mirrors the PyTorch einsum path) for validation.
# ----------------------------------------------------------------------------
def _ref_cell(x, h, c, sup_stack, w, b, hidden):
    xa = jnp.concatenate([x, h], axis=-1)
    xg = jnp.concatenate(
        [jnp.einsum('nm,bmc->bnc', sup_stack[k], xa)
         for k in range(sup_stack.shape[0])], axis=-1)
    z = jnp.einsum('bni,io->bno', xg, w) + b.reshape(-1)
    i, f, o, g = jnp.split(z, 4, axis=-1)
    i, f, o, g = jax.nn.sigmoid(i), jax.nn.sigmoid(f), jax.nn.sigmoid(o), jnp.tanh(g)
    c_new = f * c + i * g
    h_new = o * jnp.tanh(c_new)
    return h_new, c_new


def _ref_decoder(xt, init_state, supports, params, cheb_k, hidden):
    sup_stack = build_support_set(supports, cheb_k)
    cur = xt
    hid = []
    for layer, (w, b) in enumerate(params):
        h, c = init_state[layer]
        hn, cn = _ref_cell(cur, h, c, sup_stack, w, b, hidden)
        hid.append((hn, cn))
        cur = hn
    return cur, hid


# ----------------------------------------------------------------------------
if __name__ == "__main__":
    # Small deterministic config.
    B, N, DIN, DOUT, CHEB_K, LAYERS = 2, 16, 4, 32, 2, 2

    key = jax.random.PRNGKey(0)
    k_x, k_s1, k_s2, k_h, k_c, k_p = jax.random.split(key, 6)

    xt = jax.random.normal(k_x, (B, N, DIN), jnp.float32)

    # Two normalized adjacency-like supports (rows sum to 1).
    def make_support(k):
        return jax.nn.softmax(jax.random.normal(k, (N, N), jnp.float32), axis=-1)
    supports = [make_support(k_s1), make_support(k_s2)]

    # Initial (h, c) state per layer.
    init_state = []
    for layer in range(LAYERS):
        kh = jax.random.fold_in(k_h, layer)
        kc = jax.random.fold_in(k_c, layer)
        init_state.append((0.1 * jax.random.normal(kh, (B, N, DOUT), jnp.float32),
                           0.1 * jax.random.normal(kc, (B, N, DOUT), jnp.float32)))

    params = init_decoder_params(k_p, N, DIN, DOUT, CHEB_K, LAYERS)

    out, hidden = agcrnn_decoder_forward(xt, init_state, supports, params,
                                         CHEB_K, DOUT)
    out = jax.block_until_ready(out)
    hidden = jax.block_until_ready(hidden)

    # Validate against the f32 pure-JAX reference of the PyTorch semantics.
    # bf16 matmul operands (f32 accumulate / gate math) -> looser tolerance.
    ref_out, ref_hidden = _ref_decoder(xt, init_state, supports, params,
                                       CHEB_K, DOUT)
    assert out.shape == (B, N, DOUT)
    assert jnp.allclose(out, ref_out, atol=3e-2, rtol=3e-2)
    for (hn, cn), (rh, rc) in zip(hidden, ref_hidden):
        assert hn.shape == (B, N, DOUT) and cn.shape == (B, N, DOUT)
        assert jnp.allclose(hn, rh, atol=3e-2, rtol=3e-2)
        assert jnp.allclose(cn, rc, atol=3e-2, rtol=3e-2)

    print("KERNEL_OK")
</pallas_src>

<mosaic_0001>
module attributes {stable_mosaic.version = 11 : i64} {
  func.func @_decoder_kernel(%arg0: i32, %arg1: memref<1x16x4xbf16, #tpu.memory_space<vmem>>, %arg2: memref<4x16x16xbf16, #tpu.memory_space<vmem>>, %arg3: memref<1x16x32xbf16, #tpu.memory_space<vmem>>, %arg4: memref<1x16x32xf32, #tpu.memory_space<vmem>>, %arg5: memref<4x512xbf16, #tpu.memory_space<vmem>>, %arg6: memref<32x512xbf16, #tpu.memory_space<vmem>>, %arg7: memref<1x128xf32, #tpu.memory_space<vmem>>, %arg8: memref<1x16x32xbf16, #tpu.memory_space<vmem>>, %arg9: memref<1x16x32xf32, #tpu.memory_space<vmem>>, %arg10: memref<32x512xbf16, #tpu.memory_space<vmem>>, %arg11: memref<32x512xbf16, #tpu.memory_space<vmem>>, %arg12: memref<1x128xf32, #tpu.memory_space<vmem>>, %arg13: memref<1x16x32xf32, #tpu.memory_space<vmem>>, %arg14: memref<1x16x32xf32, #tpu.memory_space<vmem>>, %arg15: memref<1x16x32xf32, #tpu.memory_space<vmem>>, %arg16: memref<1x16x32xf32, #tpu.memory_space<vmem>>) attributes {dimension_semantics = [#tpu.dimension_semantics<parallel>], iteration_bounds = array<i64: 2>, scalar_prefetch = 0 : i64, scratch_operands = 0 : i64, tpu.core_type = #tpu.core_type<tc>, window_params = [{transform_indices = @transform_0, window_bounds = array<i64: 1, 16, 4>}, {pipeline_mode = #tpu.pipeline_mode<synchronous>, transform_indices = @transform_1, window_bounds = array<i64: 4, 16, 16>}, {transform_indices = @transform_2, window_bounds = array<i64: 1, 16, 32>}, {transform_indices = @transform_3, window_bounds = array<i64: 1, 16, 32>}, {pipeline_mode = #tpu.pipeline_mode<synchronous>, transform_indices = @transform_4, window_bounds = array<i64: 4, 512>}, {pipeline_mode = #tpu.pipeline_mode<synchronous>, transform_indices = @transform_5, window_bounds = array<i64: 32, 512>}, {pipeline_mode = #tpu.pipeline_mode<synchronous>, transform_indices = @transform_6, window_bounds = array<i64: 1, 128>}, {transform_indices = @transform_7, window_bounds = array<i64: 1, 16, 32>}, {transform_indices = @transform_8, window_bounds = array<i64: 1, 16, 32>}, {pipeline_mode = #tpu.pipeline_mode<synchronous>, transform_indices = @transform_9, window_bounds = array<i64: 32, 512>}, {pipeline_mode = #tpu.pipeline_mode<synchronous>, transform_indices = @transform_10, window_bounds = array<i64: 32, 512>}, {pipeline_mode = #tpu.pipeline_mode<synchronous>, transform_indices = @transform_11, window_bounds = array<i64: 1, 128>}, {transform_indices = @transform_12, window_bounds = array<i64: 1, 16, 32>}, {transform_indices = @transform_13, window_bounds = array<i64: 1, 16, 32>}, {transform_indices = @transform_14, window_bounds = array<i64: 1, 16, 32>}, {transform_indices = @transform_15, window_bounds = array<i64: 1, 16, 32>}]} {
    %c0 = arith.constant 0 : index
    %c0_0 = arith.constant 0 : index
    %c0_1 = arith.constant 0 : index
    %0 = vector.load %arg2[%c0, %c0_0, %c0_1] : memref<4x16x16xbf16, #tpu.memory_space<vmem>>, vector<1x16x16xbf16>
    %1 = vector.shape_cast %0 : vector<1x16x16xbf16> to vector<16x16xbf16>
    %2 = vector.shape_cast %1 : vector<16x16xbf16> to vector<1x16x16xbf16>
    %c1 = arith.constant 1 : index
    %c0_2 = arith.constant 0 : index
    %c0_3 = arith.constant 0 : index
    %3 = vector.load %arg2[%c1, %c0_2, %c0_3] : memref<4x16x16xbf16, #tpu.memory_space<vmem>>, vector<1x16x16xbf16>
    %4 = vector.shape_cast %3 : vector<1x16x16xbf16> to vector<16x16xbf16>
    %5 = vector.shape_cast %4 : vector<16x16xbf16> to vector<1x16x16xbf16>
    %c2 = arith.constant 2 : index
    %c0_4 = arith.constant 0 : index
    %c0_5 = arith.constant 0 : index
    %6 = vector.load %arg2[%c2, %c0_4, %c0_5] : memref<4x16x16xbf16, #tpu.memory_space<vmem>>, vector<1x16x16xbf16>
    %7 = vector.shape_cast %6 : vector<1x16x16xbf16> to vector<16x16xbf16>
    %8 = vector.shape_cast %7 : vector<16x16xbf16> to vector<1x16x16xbf16>
    %c3 = arith.constant 3 : index
    %c0_6 = arith.constant 0 : index
    %c0_7 = arith.constant 0 : index
    %9 = vector.load %arg2[%c3, %c0_6, %c0_7] : memref<4x16x16xbf16, #tpu.memory_space<vmem>>, vector<1x16x16xbf16>
    %10 = vector.shape_cast %9 : vector<1x16x16xbf16> to vector<16x16xbf16>
    %11 = vector.shape_cast %10 : vector<16x16xbf16> to vector<1x16x16xbf16>
    %c0_8 = arith.constant 0 : index
    %c0_9 = arith.constant 0 : index
    %c0_10 = arith.constant 0 : index
    %12 = vector.load %arg1[%c0_8, %c0_9, %c0_10] : memref<1x16x4xbf16, #tpu.memory_space<vmem>>, vector<1x16x4xbf16>
    %13 = vector.shape_cast %12 : vector<1x16x4xbf16> to vector<16x4xbf16>
    %c0_11 = arith.constant 0 : index
    %c0_12 = arith.constant 0 : index
    %c0_13 = arith.constant 0 : index
    %14 = vector.load %arg3[%c0_11, %c0_12, %c0_13] : memref<1x16x32xbf16, #tpu.memory_space<vmem>>, vector<1x16x32xbf16>
    %15 = vector.shape_cast %14 : vector<1x16x32xbf16> to vector<16x32xbf16>
    %c0_14 = arith.constant 0 : index
    %c0_15 = arith.constant 0 : index
    %16 = vector.load %arg5[%c0_14, %c0_15] : memref<4x512xbf16, #tpu.memory_space<vmem>>, vector<4x512xbf16>
    %cst = arith.constant dense<0.000000e+00> : vector<16x512xf32>
    %17 = tpu.matmul %13, %16, %cst {dimension_numbers = #tpu.dot_dimension_numbers<[1], [0], [0], [1], [0, 0, 1, 1], [], []>} : vector<16x4xbf16>, vector<4x512xbf16>, vector<16x512xf32> -> vector<16x512xf32>
    %c0_16 = arith.constant 0 : index
    %c0_17 = arith.constant 0 : index
    %18 = vector.load %arg6[%c0_16, %c0_17] : memref<32x512xbf16, #tpu.memory_space<vmem>>, vector<32x512xbf16>
    %cst_18 = arith.constant dense<0.000000e+00> : vector<16x512xf32>
    %19 = tpu.matmul %15, %18, %cst_18 {dimension_numbers = #tpu.dot_dimension_numbers<[1], [0], [0], [1], [0, 0, 1, 1], [], []>} : vector<16x32xbf16>, vector<32x512xbf16>, vector<16x512xf32> -> vector<16x512xf32>
    %20 = arith.addf %17, %19 : vector<16x512xf32>
    %21 = arith.truncf %20 : vector<16x512xf32> to vector<16x512xbf16>
    %22 = vector.shape_cast %21 : vector<16x512xbf16> to vector<1x16x512xbf16>
    %23 = vector.extract_strided_slice %22 {offsets = [0, 0, 0], sizes = [1, 16, 128], strides = [1, 1, 1]} : vector<1x16x512xbf16> to vector<1x16x128xbf16>
    "tpu.trace_start"() <{level = 10 : i32, message = "tnm,tmo->tno"}> : () -> ()
    %cst_19 = arith.constant dense<0.000000e+00> : vector<1x16x128xf32>
    %24 = tpu.matmul %2, %23, %cst_19 {dimension_numbers = #tpu.dot_dimension_numbers<[2], [1], [1], [2], [0, 0, 0, 1, 1, 2], [0], [0]>} : vector<1x16x16xbf16>, vector<1x16x128xbf16>, vector<1x16x128xf32> -> vector<1x16x128xf32>
    "tpu.trace_stop"() : () -> ()
    %25 = vector.extract_strided_slice %22 {offsets = [0, 0, 128], sizes = [1, 16, 128], strides = [1, 1, 1]} : vector<1x16x512xbf16> to vector<1x16x128xbf16>
    "tpu.trace_start"() <{level = 10 : i32, message = "tnm,tmo->tno"}> : () -> ()
    %cst_20 = arith.constant dense<0.000000e+00> : vector<1x16x128xf32>
    %26 = tpu.matmul %5, %25, %cst_20 {dimension_numbers = #tpu.dot_dimension_numbers<[2], [1], [1], [2], [0, 0, 0, 1, 1, 2], [0], [0]>} : vector<1x16x16xbf16>, vector<1x16x128xbf16>, vector<1x16x128xf32> -> vector<1x16x128xf32>
    "tpu.trace_stop"() : () -> ()
    %27 = arith.addf %24, %26 : vector<1x16x128xf32>
    %28 = vector.extract_strided_slice %22 {offsets = [0, 0, 256], sizes = [1, 16, 128], strides = [1, 1, 1]} : vector<1x16x512xbf16> to vector<1x16x128xbf16>
    "tpu.trace_start"() <{level = 10 : i32, message = "tnm,tmo->tno"}> : () -> ()
    %cst_21 = arith.constant dense<0.000000e+00> : vector<1x16x128xf32>
    %29 = tpu.matmul %8, %28, %cst_21 {dimension_numbers = #tpu.dot_dimension_numbers<[2], [1], [1], [2], [0, 0, 0, 1, 1, 2], [0], [0]>} : vector<1x16x16xbf16>, vector<1x16x128xbf16>, vector<1x16x128xf32> -> vector<1x16x128xf32>
    "tpu.trace_stop"() : () -> ()
    %30 = arith.addf %27, %29 : vector<1x16x128xf32>
    %31 = vector.extract_strided_slice %22 {offsets = [0, 0, 384], sizes = [1, 16, 128], strides = [1, 1, 1]} : vector<1x16x512xbf16> to vector<1x16x128xbf16>
    "tpu.trace_start"() <{level = 10 : i32, message = "tnm,tmo->tno"}> : () -> ()
    %cst_22 = arith.constant dense<0.000000e+00> : vector<1x16x128xf32>
    %32 = tpu.matmul %11, %31, %cst_22 {dimension_numbers = #tpu.dot_dimension_numbers<[2], [1], [1], [2], [0, 0, 0, 1, 1, 2], [0], [0]>} : vector<1x16x16xbf16>, vector<1x16x128xbf16>, vector<1x16x128xf32> -> vector<1x16x128xf32>
    "tpu.trace_stop"() : () -> ()
    %33 = arith.addf %30, %32 : vector<1x16x128xf32>
    %34 = vector.shape_cast %33 : vector<1x16x128xf32> to vector<16x128xf32>
    %c0_23 = arith.constant 0 : index
    %c0_24 = arith.constant 0 : index
    %35 = vector.load %arg7[%c0_23, %c0_24] : memref<1x128xf32, #tpu.memory_space<vmem>>, vector<1x128xf32>
    %36 = vector.shape_cast %35 : vector<1x128xf32> to vector<128xf32>
    %37 = vector.shape_cast %36 : vector<128xf32> to vector<1x128xf32>
    %38 = vector.broadcast %37 : vector<1x128xf32> to vector<16x128xf32>
    %39 = arith.addf %34, %38 : vector<16x128xf32>
    %40 = vector.extract_strided_slice %39 {offsets = [0, 0], sizes = [16, 96], strides = [1, 1]} : vector<16x128xf32> to vector<16x96xf32>
    %41 = arith.negf %40 : vector<16x96xf32>
    %42 = math.exp %41 : vector<16x96xf32>
    %cst_25 = arith.constant 1.000000e+00 : f32
    %43 = vector.broadcast %cst_25 : f32 to vector<16x96xf32>
    %44 = arith.addf %43, %42 : vector<16x96xf32>
    %45 = arith.divf %43, %44 : vector<16x96xf32>
    %46 = vector.extract_strided_slice %39 {offsets = [0, 96], sizes = [16, 32], strides = [1, 1]} : vector<16x128xf32> to vector<16x32xf32>
    %47 = math.tanh %46 : vector<16x32xf32>
    %48 = vector.extract_strided_slice %45 {offsets = [0, 0], sizes = [16, 32], strides = [1, 1]} : vector<16x96xf32> to vector<16x32xf32>
    %49 = vector.extract_strided_slice %45 {offsets = [0, 32], sizes = [16, 32], strides = [1, 1]} : vector<16x96xf32> to vector<16x32xf32>
    %50 = vector.extract_strided_slice %45 {offsets = [0, 64], sizes = [16, 32], strides = [1, 1]} : vector<16x96xf32> to vector<16x32xf32>
    %c0_26 = arith.constant 0 : index
    %c0_27 = arith.constant 0 : index
    %c0_28 = arith.constant 0 : index
    %51 = vector.load %arg4[%c0_26, %c0_27, %c0_28] : memref<1x16x32xf32, #tpu.memory_space<vmem>>, vector<1x16x32xf32>
    %52 = vector.shape_cast %51 : vector<1x16x32xf32> to vector<16x32xf32>
    %53 = arith.mulf %49, %52 : vector<16x32xf32>
    %54 = arith.mulf %48, %47 : vector<16x32xf32>
    %55 = arith.addf %53, %54 : vector<16x32xf32>
    %56 = math.tanh %55 : vector<16x32xf32>
    %57 = arith.mulf %50, %56 : vector<16x32xf32>
    %58 = vector.shape_cast %57 : vector<16x32xf32> to vector<1x16x32xf32>
    %c0_29 = arith.constant 0 : index
    %c0_30 = arith.constant 0 : index
    %c0_31 = arith.constant 0 : index
    %59 = vector.load %arg13[%c0_29, %c0_30, %c0_31] : memref<1x16x32xf32, #tpu.memory_space<vmem>>, vector<1x16x32xf32>
    tpu.vector_store %arg13[%c0_29, %c0_30, %c0_31], %58 {strides = array<i32>} : memref<1x16x32xf32, #tpu.memory_space<vmem>>, vector<1x16x32xf32>,
    %60 = vector.shape_cast %55 : vector<16x32xf32> to vector<1x16x32xf32>
    %c0_32 = arith.constant 0 : index
    %c0_33 = arith.constant 0 : index
    %c0_34 = arith.constant 0 : index
    %61 = vector.load %arg14[%c0_32, %c0_33, %c0_34] : memref<1x16x32xf32, #tpu.memory_space<vmem>>, vector<1x16x32xf32>
    tpu.vector_store %arg14[%c0_32, %c0_33, %c0_34], %60 {strides = array<i32>} : memref<1x16x32xf32, #tpu.memory_space<vmem>>, vector<1x16x32xf32>,
    %62 = vector.shape_cast %57 : vector<16x32xf32> to vector<1x16x32xf32>
    %63 = arith.truncf %62 : vector<1x16x32xf32> to vector<1x16x32xbf16>
    %64 = vector.shape_cast %63 : vector<1x16x32xbf16> to vector<16x32xbf16>
    %c0_35 = arith.constant 0 : index
    %c0_36 = arith.constant 0 : index
    %c0_37 = arith.constant 0 : index
    %65 = vector.load %arg8[%c0_35, %c0_36, %c0_37] : memref<1x16x32xbf16, #tpu.memory_space<vmem>>, vector<1x16x32xbf16>
    %66 = vector.shape_cast %65 : vector<1x16x32xbf16> to vector<16x32xbf16>
    %c0_38 = arith.constant 0 : index
    %c0_39 = arith.constant 0 : index
    %67 = vector.load %arg10[%c0_38, %c0_39] : memref<32x512xbf16, #tpu.memory_space<vmem>>, vector<32x512xbf16>
    %cst_40 = arith.constant dense<0.000000e+00> : vector<16x512xf32>
    %68 = tpu.matmul %64, %67, %cst_40 {dimension_numbers = #tpu.dot_dimension_numbers<[1], [0], [0], [1], [0, 0, 1, 1], [], []>} : vector<16x32xbf16>, vector<32x512xbf16>, vector<16x512xf32> -> vector<16x512xf32>
    %c0_41 = arith.constant 0 : index
    %c0_42 = arith.constant 0 : index
    %69 = vector.load %arg11[%c0_41, %c0_42] : memref<32x512xbf16, #tpu.memory_space<vmem>>, vector<32x512xbf16>
    %cst_43 = arith.constant dense<0.000000e+00> : vector<16x512xf32>
    %70 = tpu.matmul %66, %69, %cst_43 {dimension_numbers = #tpu.dot_dimension_numbers<[1], [0], [0], [1], [0, 0, 1, 1], [], []>} : vector<16x32xbf16>, vector<32x512xbf16>, vector<16x512xf32> -> vector<16x512xf32>
    %71 = arith.addf %68, %70 : vector<16x512xf32>
    %72 = arith.truncf %71 : vector<16x512xf32> to vector<16x512xbf16>
    %73 = vector.shape_cast %72 : vector<16x512xbf16> to vector<1x16x512xbf16>
    %74 = vector.extract_strided_slice %73 {offsets = [0, 0, 0], sizes = [1, 16, 128], strides = [1, 1, 1]} : vector<1x16x512xbf16> to vector<1x16x128xbf16>
    "tpu.trace_start"() <{level = 10 : i32, message = "tnm,tmo->tno"}> : () -> ()
    %cst_44 = arith.constant dense<0.000000e+00> : vector<1x16x128xf32>
    %75 = tpu.matmul %2, %74, %cst_44 {dimension_numbers = #tpu.dot_dimension_numbers<[2], [1], [1], [2], [0, 0, 0, 1, 1, 2], [0], [0]>} : vector<1x16x16xbf16>, vector<1x16x128xbf16>, vector<1x16x128xf32> -> vector<1x16x128xf32>
    "tpu.trace_stop"() : () -> ()
    %76 = vector.extract_strided_slice %73 {offsets = [0, 0, 128], sizes = [1, 16, 128], strides = [1, 1, 1]} : vector<1x16x512xbf16> to vector<1x16x128xbf16>
    "tpu.trace_start"() <{level = 10 : i32, message = "tnm,tmo->tno"}> : () -> ()
    %cst_45 = arith.constant dense<0.000000e+00> : vector<1x16x128xf32>
    %77 = tpu.matmul %5, %76, %cst_45 {dimension_numbers = #tpu.dot_dimension_numbers<[2], [1], [1], [2], [0, 0, 0, 1, 1, 2], [0], [0]>} : vector<1x16x16xbf16>, vector<1x16x128xbf16>, vector<1x16x128xf32> -> vector<1x16x128xf32>
    "tpu.trace_stop"() : () -> ()
    %78 = arith.addf %75, %77 : vector<1x16x128xf32>
    %79 = vector.extract_strided_slice %73 {offsets = [0, 0, 256], sizes = [1, 16, 128], strides = [1, 1, 1]} : vector<1x16x512xbf16> to vector<1x16x128xbf16>
    "tpu.trace_start"() <{level = 10 : i32, message = "tnm,tmo->tno"}> : () -> ()
    %cst_46 = arith.constant dense<0.000000e+00> : vector<1x16x128xf32>
    %80 = tpu.matmul %8, %79, %cst_46 {dimension_numbers = #tpu.dot_dimension_numbers<[2], [1], [1], [2], [0, 0, 0, 1, 1, 2], [0], [0]>} : vector<1x16x16xbf16>, vector<1x16x128xbf16>, vector<1x16x128xf32> -> vector<1x16x128xf32>
    "tpu.trace_stop"() : () -> ()
    %81 = arith.addf %78, %80 : vector<1x16x128xf32>
    %82 = vector.extract_strided_slice %73 {offsets = [0, 0, 384], sizes = [1, 16, 128], strides = [1, 1, 1]} : vector<1x16x512xbf16> to vector<1x16x128xbf16>
    "tpu.trace_start"() <{level = 10 : i32, message = "tnm,tmo->tno"}> : () -> ()
    %cst_47 = arith.constant dense<0.000000e+00> : vector<1x16x128xf32>
    %83 = tpu.matmul %11, %82, %cst_47 {dimension_numbers = #tpu.dot_dimension_numbers<[2], [1], [1], [2], [0, 0, 0, 1, 1, 2], [0], [0]>} : vector<1x16x16xbf16>, vector<1x16x128xbf16>, vector<1x16x128xf32> -> vector<1x16x128xf32>
    "tpu.trace_stop"() : () -> ()
    %84 = arith.addf %81, %83 : vector<1x16x128xf32>
    %85 = vector.shape_cast %84 : vector<1x16x128xf32> to vector<16x128xf32>
    %c0_48 = arith.constant 0 : index
    %c0_49 = arith.constant 0 : index
    %86 = vector.load %arg12[%c0_48, %c0_49] : memref<1x128xf32, #tpu.memory_space<vmem>>, vector<1x128xf32>
    %87 = vector.shape_cast %86 : vector<1x128xf32> to vector<128xf32>
    %88 = vector.shape_cast %87 : vector<128xf32> to vector<1x128xf32>
    %89 = vector.broadcast %88 : vector<1x128xf32> to vector<16x128xf32>
    %90 = arith.addf %85, %89 : vector<16x128xf32>
    %91 = vector.extract_strided_slice %90 {offsets = [0, 0], sizes = [16, 96], strides = [1, 1]} : vector<16x128xf32> to vector<16x96xf32>
    %92 = arith.negf %91 : vector<16x96xf32>
    %93 = math.exp %92 : vector<16x96xf32>
    %cst_50 = arith.constant 1.000000e+00 : f32
    %94 = vector.broadcast %cst_50 : f32 to vector<16x96xf32>
    %95 = arith.addf %94, %93 : vector<16x96xf32>
    %96 = arith.divf %94, %95 : vector<16x96xf32>
    %97 = vector.extract_strided_slice %90 {offsets = [0, 96], sizes = [16, 32], strides = [1, 1]} : vector<16x128xf32> to vector<16x32xf32>
    %98 = math.tanh %97 : vector<16x32xf32>
    %99 = vector.extract_strided_slice %96 {offsets = [0, 0], sizes = [16, 32], strides = [1, 1]} : vector<16x96xf32> to vector<16x32xf32>
    %100 = vector.extract_strided_slice %96 {offsets = [0, 32], sizes = [16, 32], strides = [1, 1]} : vector<16x96xf32> to vector<16x32xf32>
    %101 = vector.extract_strided_slice %96 {offsets = [0, 64], sizes = [16, 32], strides = [1, 1]} : vector<16x96xf32> to vector<16x32xf32>
    %c0_51 = arith.constant 0 : index
    %c0_52 = arith.constant 0 : index
    %c0_53 = arith.constant 0 : index
    %102 = vector.load %arg9[%c0_51, %c0_52, %c0_53] : memref<1x16x32xf32, #tpu.memory_space<vmem>>, vector<1x16x32xf32>
    %103 = vector.shape_cast %102 : vector<1x16x32xf32> to vector<16x32xf32>
    %104 = arith.mulf %100, %103 : vector<16x32xf32>
    %105 = arith.mulf %99, %98 : vector<16x32xf32>
    %106 = arith.addf %104, %105 : vector<16x32xf32>
    %107 = math.tanh %106 : vector<16x32xf32>
    %108 = arith.mulf %101, %107 : vector<16x32xf32>
    %109 = vector.shape_cast %108 : vector<16x32xf32> to vector<1x16x32xf32>
    %c0_54 = arith.constant 0 : index
    %c0_55 = arith.constant 0 : index
    %c0_56 = arith.constant 0 : index
    %110 = vector.load %arg15[%c0_54, %c0_55, %c0_56] : memref<1x16x32xf32, #tpu.memory_space<vmem>>, vector<1x16x32xf32>
    tpu.vector_store %arg15[%c0_54, %c0_55, %c0_56], %109 {strides = array<i32>} : memref<1x16x32xf32, #tpu.memory_space<vmem>>, vector<1x16x32xf32>,
    %111 = vector.shape_cast %106 : vector<16x32xf32> to vector<1x16x32xf32>
    %c0_57 = arith.constant 0 : index
    %c0_58 = arith.constant 0 : index
    %c0_59 = arith.constant 0 : index
    %112 = vector.load %arg16[%c0_57, %c0_58, %c0_59] : memref<1x16x32xf32, #tpu.memory_space<vmem>>, vector<1x16x32xf32>
    tpu.vector_store %arg16[%c0_57, %c0_58, %c0_59], %111 {strides = array<i32>} : memref<1x16x32xf32, #tpu.memory_space<vmem>>, vector<1x16x32xf32>,
    return
  }
  func.func @transform_0(%arg0: i32) -> (i32, i32, i32) {
    %c0_i32 = arith.constant 0 : i32
    %c0_i32_0 = arith.constant 0 : i32
    %c0_i32_1 = arith.constant 0 : i32
    return %arg0, %c0_i32, %c0_i32_0 : i32, i32, i32
  }
  func.func @transform_1(%arg0: i32) -> (i32, i32, i32) {
    %c0_i32 = arith.constant 0 : i32
    %c0_i32_0 = arith.constant 0 : i32
    %c0_i32_1 = arith.constant 0 : i32
    %c0_i32_2 = arith.constant 0 : i32
    return %c0_i32, %c0_i32_0, %c0_i32_1 : i32, i32, i32
  }
  func.func @transform_2(%arg0: i32) -> (i32, i32, i32) {
    %c0_i32 = arith.constant 0 : i32
    %c0_i32_0 = arith.constant 0 : i32
    %c0_i32_1 = arith.constant 0 : i32
    return %arg0, %c0_i32, %c0_i32_0 : i32, i32, i32
  }
  func.func @transform_3(%arg0: i32) -> (i32, i32, i32) {
    %c0_i32 = arith.constant 0 : i32
    %c0_i32_0 = arith.constant 0 : i32
    %c0_i32_1 = arith.constant 0 : i32
    return %arg0, %c0_i32, %c0_i32_0 : i32, i32, i32
  }
  func.func @transform_4(%arg0: i32) -> (i32, i32) {
    %c0_i32 = arith.constant 0 : i32
    %c0_i32_0 = arith.constant 0 : i32
    %c0_i32_1 = arith.constant 0 : i32
    return %c0_i32, %c0_i32_0 : i32, i32
  }
  func.func @transform_5(%arg0: i32) -> (i32, i32) {
    %c0_i32 = arith.constant 0 : i32
    %c0_i32_0 = arith.constant 0 : i32
    %c0_i32_1 = arith.constant 0 : i32
    return %c0_i32, %c0_i32_0 : i32, i32
  }
  func.func @transform_6(%arg0: i32) -> (i32, i32) {
    %c0_i32 = arith.constant 0 : i32
    %c0_i32_0 = arith.constant 0 : i32
    %c0_i32_1 = arith.constant 0 : i32
    return %c0_i32, %c0_i32_0 : i32, i32
  }
  func.func @transform_7(%arg0: i32) -> (i32, i32, i32) {
    %c0_i32 = arith.constant 0 : i32
    %c0_i32_0 = arith.constant 0 : i32
    %c0_i32_1 = arith.constant 0 : i32
    return %arg0, %c0_i32, %c0_i32_0 : i32, i32, i32
  }
  func.func @transform_8(%arg0: i32) -> (i32, i32, i32) {
    %c0_i32 = arith.constant 0 : i32
    %c0_i32_0 = arith.constant 0 : i32
    %c0_i32_1 = arith.constant 0 : i32
    return %arg0, %c0_i32, %c0_i32_0 : i32, i32, i32
  }
  func.func @transform_9(%arg0: i32) -> (i32, i32) {
    %c0_i32 = arith.constant 0 : i32
    %c0_i32_0 = arith.constant 0 : i32
    %c0_i32_1 = arith.constant 0 : i32
    return %c0_i32, %c0_i32_0 : i32, i32
  }
  func.func @transform_10(%arg0: i32) -> (i32, i32) {
    %c0_i32 = arith.constant 0 : i32
    %c0_i32_0 = arith.constant 0 : i32
    %c0_i32_1 = arith.constant 0 : i32
    return %c0_i32, %c0_i32_0 : i32, i32
  }
  func.func @transform_11(%arg0: i32) -> (i32, i32) {
    %c0_i32 = arith.constant 0 : i32
    %c0_i32_0 = arith.constant 0 : i32
    %c0_i32_1 = arith.constant 0 : i32
    return %c0_i32, %c0_i32_0 : i32, i32
  }
  func.func @transform_12(%arg0: i32) -> (i32, i32, i32) {
    %c0_i32 = arith.constant 0 : i32
    %c0_i32_0 = arith.constant 0 : i32
    %c0_i32_1 = arith.constant 0 : i32
    return %arg0, %c0_i32, %c0_i32_0 : i32, i32, i32
  }
  func.func @transform_13(%arg0: i32) -> (i32, i32, i32) {
    %c0_i32 = arith.constant 0 : i32
    %c0_i32_0 = arith.constant 0 : i32
    %c0_i32_1 = arith.constant 0 : i32
    return %arg0, %c0_i32, %c0_i32_0 : i32, i32, i32
  }
  func.func @transform_14(%arg0: i32) -> (i32, i32, i32) {
    %c0_i32 = arith.constant 0 : i32
    %c0_i32_0 = arith.constant 0 : i32
    %c0_i32_1 = arith.constant 0 : i32
    return %arg0, %c0_i32, %c0_i32_0 : i32, i32, i32
  }
  func.func @transform_15(%arg0: i32) -> (i32, i32, i32) {
    %c0_i32 = arith.constant 0 : i32
    %c0_i32_0 = arith.constant 0 : i32
    %c0_i32_1 = arith.constant 0 : i32
    return %arg0, %c0_i32, %c0_i32_0 : i32, i32, i32
  }
}

</mosaic_0001>

<bundles_post_ra>
// kernel: tpu_custom_call.1
= control target key start
LH: loop header
LB: loop body
LE: loop exit
PB: predicated region body
PF: predicated region fallthrough
CT: control target
= control target key end

     0   :  { %s3712_s0 = inlined_call_operand.vmem [shape: bf16[2,16,4], index: 0, kind: input, shape index: {}]   ;;  %s3713_s1 = inlined_call_operand.hbm [shape: bf16[4,16,16], index: 1, kind: input, shape index: {}]   ;;  %s3714_s2 = inlined_call_operand.vmem [shape: bf16[2,16,32], index: 2, kind: input, shape index: {}]   ;;  %s3715_s3 = inlined_call_operand.hbm [shape: f32[2,16,32], index: 3, kind: input, shape index: {}]   ;;  %s3716_s4 = inlined_call_operand.hbm [shape: bf16[4,512], index: 4, kind: input, shape index: {}]   ;;  %s3717_s5 = inlined_call_operand.hbm [shape: bf16[32,512], index: 5, kind: input, shape index: {}]   ;;  %s3718_s6 = inlined_call_operand.vmem [shape: f32[1,128], index: 6, kind: input, shape index: {}]   ;;  %s3719_s7 = inlined_call_operand.hbm [shape: bf16[2,16,32], index: 7, kind: input, shape index: {}]   ;;  %s3720_s8 = inlined_call_operand.vmem [shape: f32[2,16,32], index: 8, kind: input, shape index: {}]   ;;  %s3721_s9 = inlined_call_operand.hbm [shape: bf16[32,512], index: 9, kind: input, shape index: {}]   ;;  %s3722_s10 = inlined_call_operand.hbm [shape: bf16[32,512], index: 10, kind: input, shape index: {}]   ;;  %s3723_s11 = inlined_call_operand.vmem [shape: f32[1,128], index: 11, kind: input, shape index: {}]   ;;  %s3724_s12 = inlined_call_operand.hbm [shape: f32[2,16,32], index: 12, kind: output, shape index: {0}]   ;;  %s3725_s13 = inlined_call_operand.hbm [shape: f32[2,16,32], index: 13, kind: output, shape index: {1}]   ;;  %s3726_s14 = inlined_call_operand.hbm [shape: f32[2,16,32], index: 14, kind: output, shape index: {2}]   ;;  %s3727_s15 = inlined_call_operand.hbm [shape: f32[2,16,32], index: 15, kind: output, shape index: {3}]  }
   0x1   :  { %3740 = sst [smem:[#allocation31_spill]] %s3712_s0 }
   0x2   :  { %3741 = sst [smem:[#allocation32_spill]] %s3713_s1 }
   0x3   :  { %3742 = sst [smem:[#allocation33_spill]] %s3714_s2 }
   0x4   :  { %3743 = sst [smem:[#allocation34_spill]] %s3715_s3 }
   0x5   :  { %3744 = sst [smem:[#allocation35_spill]] %s3716_s4 }
   0x6   :  { %3745 = sst [smem:[#allocation36_spill]] %s3718_s6 }
   0x7   :  { %3746 = sst [smem:[#allocation37_spill]] %s3720_s8 }
   0x8   :  { %3747 = sst [smem:[#allocation38_spill]] %s3723_s11 }
   0x9   :  { %3748 = sst [smem:[#allocation39_spill]] %s3724_s12 }
   0xa   :  { %3749 = sst [smem:[#allocation40_spill]] %s3725_s13 }
   0xb   :  { %3750 = sst [smem:[#allocation41_spill]] %s3726_s14 }
   0xc   :  { %3751 = sst [smem:[#allocation42_spill]] %s3727_s15 }
   0xd   :  { %21 = vsyncpa [#allocation3], 0 }
   0xe   :  { %22 = vsyncpa [#allocation6], 0 }
   0xf   :  { %24 = vsyncpa [#allocation6 + $0x1], 0 }
  0x10   :  { %25 = vsyncpa [#allocation9], 0 }
  0x11   :  { %26 = vsyncpa [#allocation4], 0 }
  0x12   :  { %28 = vsyncpa [#allocation4 + $0x1], 0 }
  0x13   :  { %29 = vsyncpa [#allocation15], 0 }
  0x14   :  { %31 = vsyncpa [#allocation15 + $0x1], 0 }
  0x15   :  { %32 = vsyncpa [#allocation18], 0 }
  0x16   :  { %34 = vsyncpa [#allocation18 + $0x1], 0  ;;  %s3066_s18 = smov 0   ;;  %s3068_s19 = smov 0  }
  0x17   :  { %s3070_s20 = smov 0   ;;  %s3072_s21 = smov 0  }
  0x18 LB: > { %3752 = sst [smem:[#allocation29_spill]] %s2946_s18  ;;  %s3087_s22 = sadd.s32 4294967295, %s2958_s21   ;;  %s2958_s21 = sphi %s3072_s21, %s3796_s21   ;;  %s2954_s20 = sphi %s3070_s20, %s3795_s20   ;;  %s2950_s19 = sphi %s3068_s19, %s3794_s19   ;;  %s2946_s18 = sphi %s3066_s18, %s3793_s18  }
  0x19   : > { %s3728_s23 = sadd.s32 4294967294, %s2958_s21   ;;  %p133_p0 = scmp.ne.s32.totalorder %s2950_s19, %s2946_s18 }
  0x1a   : > { %p3734_p1 = scmp.eq.s32.totalorder %s3087_s22, 0  ;;  %p341_p3 = scmp.eq.s32.totalorder %s3728_s23, 1 }
  0x1b   : > { %p2179_p5 = scmp.ge.s32.totalorder %s2958_s21, 1  ;;  %p426_p7 = scmp.lt.s32.totalorder %s2958_s21, 3 }
  0x1c   : > { %p3098_p4 = por %p3734_p1, %p133_p0  ;;  %p3103_p6 = por %p341_p3, %p133_p0 }
  0x1d   : > { %p3108_p8 = pnand %p2179_p5, %p426_p7  ;;  %s2960_s27 = smov [#allocation7]  }
  0x1e   : > { %s3753_s24 = scalar_select %p3098_p4, 1, 0 }
  0x1f   : > { %s3754_s25 = scalar_select %p3103_p6, 1, 0 }
  0x20   : > { %s3756_s26 = scalar_select %p3108_p8, 1, 0 }
  0x21   : > { %3755 = sst [smem:[#allocation30_spill]] %s3754_s25  ;;  %s452_s28 = sshll.u32 %s2960_s27, 4  ;;  %s453_s28 = int_to_ptr.vmem [resolvable:$true] %s452_s28 }
  0x22   : > { %p2400_p10 = pneg %p3108_p8  ;;  %s2961_s29 = smov [#allocation2]  }
  0x23   : > { %s438_s30 = sshll.u32 %s2961_s29, 4  ;;  %s2962_s17 = smov [#allocation8]   ;;  %s3121_s30 = int_to_ptr.vmem [resolvable:$true] %s438_s30 }
  0x24   : > { %p3117_p11 = pnand %p2400_p10, %p3734_p1  ;;  %s3123_s23 = sshll.u32 %s2962_s17, 4  ;;  %s463_s23 = int_to_ptr.vmem [resolvable:$true] %s3123_s23 }
  0x25   : > { %s3758_s4 = sld [smem:[#allocation35_spill]] }
  0x26   : > { %p3133_p13 = pneg %p3117_p11 }
  0x2b   : > { %s2576_s27 = scalar_lea.hbm %s3758_s4, 128 }
  0x2c   : > { %p2577_p12 = scmp.ne.s32.totalorder %s3758_s4, %s2576_s27  ;;  %p2583_p5 = scmp.lt.u32.totalorder %s2576_s27, %s3758_s4 }
  0x2e   : > { %p2579_p0 = pnand %p3133_p13, %p2577_p12 }
  0x30   : > { %p2580_p3 = pneg %p2579_p0 }
  0x32   : > { %p2585_p7 = pnand %p2583_p5, %p2580_p3 }
  0x34   : > { %2588 = shalt.err (!%p2585_p7)
}
  0x35   : > { %s2589_s18 = scalar_lea.vmem %s453_s28, 128  ;;  %p2597_p2 = scmp.lt.s32.totalorder %s453_s28, %s453_s28 }
  0x36   : > { %p2590_p10 = scmp.ne.s32.totalorder %s453_s28, %s2589_s18  ;;  %p2598_p6 = scmp.lt.s32.totalorder %s2589_s18, %s2589_s18 }
  0x38   : > { %p2592_p9 = pnand %p2590_p10, %p3133_p13  ;;  %p2599_p4 = por %p2598_p6, %p2597_p2 }
  0x3a   : > { %p2593_p1 = pneg %p2592_p9 }
  0x3c   : > { %p2600_p8 = pnand %p2599_p4, %p2593_p1 }
  0x3e   : > { %2603 = shalt.err (!%p2600_p8)
}
  0x3f   : > { %2406 = dma.hbm_to_vmem [thread:$0]  (!%p3117_p11), %s3758_s4, 128, %s453_s28, [#allocation6]  }
  0x40   : > { %s3760_s1 = sld [smem:[#allocation32_spill]] }
  0x46   : > { %s2604_s27 = scalar_lea.hbm %s3760_s1, 512 }
  0x47   : > { %p2605_p9 = scmp.ne.s32.totalorder %s3760_s1, %s2604_s27  ;;  %p2611_p1 = scmp.lt.u32.totalorder %s2604_s27, %s3760_s1 }
  0x49   : > { %p2607_p12 = pnand %p2605_p9, %p3133_p13 }
  0x4b   : > { %p2608_p2 = pneg %p2607_p12 }
  0x4d   : > { %p2613_p4 = pnand %p2611_p1, %p2608_p2 }
  0x4f   : > { %2616 = shalt.err (!%p2613_p4)
}
  0x50   : > { %s2617_s28 = scalar_lea.vmem %s3121_s30, 512  ;;  %p2625_p3 = scmp.lt.s32.totalorder %s3121_s30, %s3121_s30 }
  0x51   : > { %p2618_p6 = scmp.ne.s32.totalorder %s3121_s30, %s2617_s28  ;;  %p2626_p5 = scmp.lt.s32.totalorder %s2617_s28, %s2617_s28 }
  0x53   : > { %p2620_p8 = pnand %p2618_p6, %p3133_p13  ;;  %p2627_p7 = por %p2626_p5, %p2625_p3 }
  0x55   : > { %p2621_p0 = pneg %p2620_p8 }
  0x57   : > { %p2628_p10 = pnand %p2627_p7, %p2621_p0 }
  0x59   : > { %2631 = shalt.err (!%p2628_p10)
}
  0x5a   : > { %s3738_s13 = smov 64   ;;  %s3739_s8 = smov 4  }
  0x5b   : > { %2403 = dma.hbm_to_vmem [thread:$0]  (!%p3117_p11), %s3760_s1, 512, %s3121_s30, [#allocation3], %s3738_s13, %s3738_s13, %s3739_s8  }
  0x5c   : > { %s2632_s27 = scalar_lea.hbm %s3717_s5, 1024 }
  0x5d   : > { %p2633_p9 = scmp.ne.s32.totalorder %s3717_s5, %s2632_s27  ;;  %p2639_p1 = scmp.lt.u32.totalorder %s2632_s27, %s3717_s5 }
  0x5f   : > { %p2635_p12 = pnand %p2633_p9, %p3133_p13 }
  0x61   : > { %p2636_p2 = pneg %p2635_p12 }
  0x63   : > { %p2641_p4 = pnand %p2639_p1, %p2636_p2 }
  0x65   : > { %2644 = shalt.err (!%p2641_p4)
}
  0x66   : > { %s2645_s14 = scalar_lea.vmem %s463_s23, 1024  ;;  %p2653_p3 = scmp.lt.s32.totalorder %s463_s23, %s463_s23 }
  0x67   : > { %p2646_p6 = scmp.ne.s32.totalorder %s463_s23, %s2645_s14  ;;  %p2654_p5 = scmp.lt.s32.totalorder %s2645_s14, %s2645_s14 }
  0x69   : > { %p2648_p8 = pnand %p2646_p6, %p3133_p13  ;;  %p2655_p7 = por %p2654_p5, %p2653_p3 }
  0x6b   : > { %p2649_p0 = pneg %p2648_p8 }
  0x6d   : > { %p2656_p10 = pnand %p2655_p7, %p2649_p0 }
  0x6f   : > { %2659 = shalt.err (!%p2656_p10)
}
  0x70   : > { %s2965_s30 = smov 256   ;;  %s2966_s15 = smov 16  }
  0x71   : > { %2409 = dma.hbm_to_vmem [thread:$0]  (!%p3117_p11), %s3717_s5, 1024, %s463_s23, [#allocation9], %s2965_s30, %s2965_s30, %s2966_s15  }
  0x72   : > { %s2967_s25 = smov [#allocation11]   ;;  %s2968_s17 = smov [#allocation12]  }
  0x73   : > { %s478_s27 = sshll.u32 %s2967_s25, 4  ;;  %s491_s18 = sshll.u32 %s2968_s17, 4  ;;  %s479_s27 = int_to_ptr.vmem [resolvable:$true] %s478_s27  ;;  %s492_s18 = int_to_ptr.vmem [resolvable:$true] %s491_s18 }
  0x74   : > { %s2660_s13 = scalar_lea.hbm %s3721_s9, 1024 }
  0x75   : > { %p2661_p9 = scmp.ne.s32.totalorder %s3721_s9, %s2660_s13  ;;  %p2667_p1 = scmp.lt.u32.totalorder %s2660_s13, %s3721_s9 }
  0x77   : > { %p2663_p12 = pnand %p2661_p9, %p3133_p13 }
  0x79   : > { %p2664_p2 = pneg %p2663_p12 }
  0x7b   : > { %p2669_p4 = pnand %p2667_p1, %p2664_p2 }
  0x7d   : > { %2672 = shalt.err (!%p2669_p4)
}
  0x7e   : > { %s2673_s23 = scalar_lea.vmem %s479_s27, 1024  ;;  %p2681_p3 = scmp.lt.s32.totalorder %s479_s27, %s479_s27 }
  0x7f   : > { %p2674_p6 = scmp.ne.s32.totalorder %s479_s27, %s2673_s23  ;;  %p2682_p5 = scmp.lt.s32.totalorder %s2673_s23, %s2673_s23 }
  0x81   : > { %p2676_p8 = pnand %p2674_p6, %p3133_p13  ;;  %p2683_p7 = por %p2682_p5, %p2681_p3 }
  0x83   : > { %p2677_p0 = pneg %p2676_p8 }
  0x85   : > { %p2684_p10 = pnand %p2683_p7, %p2677_p0 }
  0x87   : > { %2687 = shalt.err (!%p2684_p10)
}
  0x88   : > { %2412 = dma.hbm_to_vmem [thread:$0]  (!%p3117_p11), %s3721_s9, 1024, %s479_s27, [#allocation6], %s2965_s30, %s2965_s30, %s2966_s15  }
  0x89   : > { %s2688_s8 = scalar_lea.hbm %s3722_s10, 1024 }
  0x8a   : > { %p2689_p9 = scmp.ne.s32.totalorder %s3722_s10, %s2688_s8  ;;  %p2695_p1 = scmp.lt.u32.totalorder %s2688_s8, %s3722_s10 }
  0x8c   : > { %p2691_p12 = pnand %p2689_p9, %p3133_p13 }
  0x8e   : > { %p2692_p2 = pneg %p2691_p12 }
  0x90   : > { %p2697_p4 = pnand %p2695_p1, %p2692_p2 }
  0x92   : > { %2700 = shalt.err (!%p2697_p4)
}
  0x93   : > { %s2701_s28 = scalar_lea.vmem %s492_s18, 1024  ;;  %p2709_p3 = scmp.lt.s32.totalorder %s492_s18, %s492_s18 }
  0x94   : > { %p2702_p6 = scmp.ne.s32.totalorder %s492_s18, %s2701_s28  ;;  %p2710_p5 = scmp.lt.s32.totalorder %s2701_s28, %s2701_s28 }
  0x96   : > { %p2704_p8 = pnand %p2702_p6, %p3133_p13  ;;  %p2711_p7 = por %p2710_p5, %p2709_p3 }
  0x98   : > { %p2705_p0 = pneg %p2704_p8 }
  0x9a   : > { %p2712_p10 = pnand %p2711_p7, %p2705_p0 }
  0x9c   : > { %2715 = shalt.err (!%p2712_p10)
}
  0x9d   : > { %2415 = dma.hbm_to_vmem [thread:$0]  (!%p3117_p11), %s3722_s10, 1024, %s492_s18, [#allocation9], %s2965_s30, %s2965_s30, %s2966_s15  }
  0x9e   : > { %s3240_s16 = sadd.s32 1, %s2958_s21   ;;  %s120_s23 = sadd.s32 1, %s2954_s20 }
  0x9f   : > { %s117_s29 = ssub.s32 %s2958_s21, %s3240_s16  ;;  %p127_p9 = scmp.ne.s32.totalorder %s2954_s20, %s2950_s19 }
  0xa0   : > { %p118_p13 = scmp.eq.s32.totalorder %s117_s29, 0  ;;  %p128_p12 = scmp.eq.s32.totalorder %s2958_s21, 0 }
  0xa1   : > { %p2441_p2 = scmp.lt.s32.totalorder %s2958_s21, 2  ;;  %p3761_p4 = scmp.eq.s32.totalorder %s3087_s22, 1 }
  0xa2   : > { %s3250_s1 = scalar_select %p118_p13, %s2954_s20, %s120_s23  }
  0xa3   : > { %p129_p1 = por %p128_p12, %p127_p9  ;;  %p3254_p6 = por %p3761_p4, %p127_p9 }
  0xa4   : > { %s524_s11 = sand.u32 1, %s2958_s21   ;;  %s526_s30 = sand.u32 1, %s2954_s20  }
  0xa5   : > { %s2186_s15 = sshll.u32 %s526_s30, 4  ;;  %s2279_s18 = sshll.u32 %s2958_s21, 8 }
  0xa6   : > { %s3763_s3 = sld [smem:[#allocation34_spill]]  ;;  %s528_s12 = scalar_lea.vmem [#allocation5], %s2186_s15 }
  0xa7   : > { %s535_s25 = sshll.u32 %s528_s12, 4  ;;  %p3270_p11 = pnand %p2441_p2, %p129_p1  ;;  %s3268_s25 = int_to_ptr.vmem [resolvable:$true] %s535_s25 }
  0xa8   : > { %s3276_s28 = scalar_lea.sflag [#allocation6], %s524_s11 }
  0xa9   : > { %p2718_p0 = pneg %p3270_p11 }
  0xac   : > { %s3266_s4 = scalar_lea.hbm %s3763_s3, %s2279_s18  ;;  %s2721_s23 = scalar_lea.hbm %s3763_s3, 512 }
  0xad   : > { %s2716_s27 = scalar_lea.hbm %s3266_s4, 256  ;;  %p2722_p7 = scmp.lt.u32.totalorder %s3266_s4, %s3763_s3 }
  0xae   : > { %p2717_p8 = scmp.ne.s32.totalorder %s3266_s4, %s2716_s27  ;;  %p2723_p10 = scmp.lt.u32.totalorder %s2721_s23, %s2716_s27 }
  0xaf   : > { %p2725_p9 = scmp.lt.u32.totalorder %s2716_s27, %s3266_s4 }
  0xb0   : > { %p2719_p3 = pnand %p2718_p0, %p2717_p8  ;;  %p2724_p13 = por %p2723_p10, %p2722_p7 }
  0xb2   : > { %p2720_p5 = pneg %p2719_p3  ;;  %p2726_p12 = por %p2725_p9, %p2724_p13 }
  0xb4   : > { %p2727_p2 = pnand %p2726_p12, %p2720_p5 }
  0xb6   : > { %2730 = shalt.err (!%p2727_p2)
}
  0xb7   : > { %s2731_s13 = scalar_lea.vmem %s3268_s25, 256  ;;  %s2969_s8 = smov [#allocation5]  }
  0xb8   : > { %p2732_p1 = scmp.ne.s32.totalorder %s3268_s25, %s2731_s13  ;;  %s2736_s12 = sshll.u32 %s2969_s8, 4  ;;  %s2737_s12 = int_to_ptr.vmem [resolvable:$false] %s2736_s12 }
  0xb9   : > { %s2738_s14 = scalar_lea.vmem %s2737_s12, 512  ;;  %p2739_p3 = scmp.lt.s32.totalorder %s3268_s25, %s2737_s12 }
  0xba   : > { %p2734_p4 = pnand %p2732_p1, %p2718_p0  ;;  %p2740_p7 = scmp.lt.s32.totalorder %s2738_s14, %s2731_s13 }
  0xbc   : > { %p2735_p8 = pneg %p2734_p4  ;;  %p2741_p10 = por %p2740_p7, %p2739_p3 }
  0xbe   : > { %p2742_p13 = pnand %p2741_p10, %p2735_p8 }
  0xc0   : > { %2745 = shalt.err (!%p2742_p13)
}
  0xc1   : > { %s2970_s27 = smov 128   ;;  %s2971_s29 = smov 8  }
  0xc2   : > { %2419 = dma.hbm_to_vmem [thread:$0]  (!%p3270_p11), %s3266_s4, 256, %s3268_s25, %s3276_s28, %s2970_s27, %s2970_s27, %s2971_s29  }
  0xc3   : > { %s2189_s23 = sshll.u32 %s526_s30, 3  ;;  %s2280_s15 = sshll.u32 %s2958_s21, 7 }
  0xc4   : > { %s3310_s8 = scalar_lea.hbm %s3719_s7, %s2280_s15  ;;  %s549_s12 = scalar_lea.vmem [#allocation10], %s2189_s23 }
  0xc5   : > { %s556_s14 = sshll.u32 %s549_s12, 4  ;;  %s3316_s3 = scalar_lea.sflag [#allocation3], %s524_s11  ;;  %s3312_s14 = int_to_ptr.vmem [resolvable:$true] %s556_s14 }
  0xc6   : > { %s2746_s4 = scalar_lea.hbm %s3310_s8, 128  ;;  %s2751_s28 = scalar_lea.hbm %s3719_s7, 256 }
  0xc7   : > { %p2747_p5 = scmp.ne.s32.totalorder %s3310_s8, %s2746_s4  ;;  %p2752_p2 = scmp.lt.u32.totalorder %s3310_s8, %s3719_s7 }
  0xc8   : > { %p2753_p1 = scmp.lt.u32.totalorder %s2751_s28, %s2746_s4  ;;  %p2755_p8 = scmp.lt.u32.totalorder %s2746_s4, %s3310_s8 }
  0xc9   : > { %p2749_p9 = pnand %p2747_p5, %p2718_p0 }
  0xca   : > { %p2754_p4 = por %p2753_p1, %p2752_p2 }
  0xcb   : > { %p2750_p12 = pneg %p2749_p9 }
  0xcc   : > { %p2756_p3 = por %p2755_p8, %p2754_p4 }
  0xce   : > { %p2757_p7 = pnand %p2756_p3, %p2750_p12 }
  0xd0   : > { %2760 = shalt.err (!%p2757_p7)
}
  0xd1   : > { %s2761_s11 = scalar_lea.vmem %s3312_s14, 128  ;;  %s2972_s23 = smov [#allocation10]  }
  0xd2   : > { %p2762_p10 = scmp.ne.s32.totalorder %s3312_s14, %s2761_s11  ;;  %s2766_s15 = sshll.u32 %s2972_s23, 4  ;;  %s2767_s15 = int_to_ptr.vmem [resolvable:$false] %s2766_s15 }
  0xd3   : > { %s2768_s18 = scalar_lea.vmem %s2767_s15, 256  ;;  %p2769_p9 = scmp.lt.s32.totalorder %s3312_s14, %s2767_s15 }
  0xd4   : > { %p2764_p13 = pnand %p2762_p10, %p2718_p0  ;;  %p2770_p2 = scmp.lt.s32.totalorder %s2768_s18, %s2761_s11 }
  0xd6   : > { %p2765_p5 = pneg %p2764_p13  ;;  %p2771_p1 = por %p2770_p2, %p2769_p9 }
  0xd8   : > { %p2772_p4 = pnand %p2771_p1, %p2765_p5 }
  0xda   : > { %2775 = shalt.err (!%p2772_p4)
}
  0xdb   : > { %s3765_s13 = smov 4   ;;  %s3766_s12 = smov 64  }
  0xdc   : > { %2422 = dma.hbm_to_vmem [thread:$0]  (!%p3270_p11), %s3310_s8, 128, %s3312_s14, %s3316_s3, %s3766_s12, %s3766_s12, %s3765_s13  }
  0xdd   : > { %p3767_p0 = scmp.ne.s32.totalorder %s3756_s26, 0 }
  0xde   : > { %p3768_p12 = scmp.eq.s32.totalorder (!%p3767_p0), %s3087_s22, 0 }
  0xdf   : > { %576 = sbr.rel (%p3767_p0) target bundleno = 2190 (0x88e), region = 68 }
  0xe6   : > { %2905 = dma.done.wait (%p3768_p12), [#allocation3], 512   ;;  %p3769_p8 = pmov %p3768_p12 }
  0xe7   : > { %s3352_s17 = sand.u32 1, %s3087_s22   ;;  %s3355_s4 = sand.u32 1, %s2950_s19  }
  0xe8   : > { %2907 = vsyncadd (%p3769_p8), [#allocation3], 4294966784  ;;  %s3358_s30 = sshll.u32 %s3355_s4, 4  ;;  %s583_s3 = scalar_lea.sflag [#allocation6], %s3352_s17 }
  0xe9   : > { %s586_s26 = scalar_lea.vmem [#allocation5], %s3358_s30  ;;  %p3770_p11 = scmp.ne.s32.totalorder %s3753_s24, 0 }
  0xeb   : > { %2909 = dma.done.wait (%p3770_p11), %s583_s3, 256  }
  0xec   : > { %2911 = vsyncadd (%p3770_p11), %s583_s3, 4294967040  ;;  %p3771_p3 = pmov %p3769_p8 }
  0xee   : > { %2913 = dma.done.wait (%p3771_p3), [#allocation6], 128   ;;  %p3772_p7 = pmov %p3771_p3 }
  0xef   : > { %p3773_p10 = pmov %p3771_p3 }
  0xf0   : > { %2915 = vsyncadd (%p3772_p7), [#allocation6], 4294967168 }
  0xf1   : > { %2917 = dma.done.wait (%p3773_p10), [#allocation9], 1024   ;;  %p3774_p13 = pmov %p3771_p3 }
  0xf2   : > { %s2197_s8 = sshll.u32 %s3355_s4, 3  ;;  %s600_s14 = scalar_lea.sflag [#allocation3], %s3352_s17 }
  0xf3   : > { %2919 = vsyncadd (%p3774_p13), [#allocation9], 4294966272  ;;  %s3376_s25 = scalar_lea.vmem [#allocation10], %s2197_s8 }
  0xf4   : > { %2921 = dma.done.wait (%p3770_p11), %s600_s14, 128  }
  0xf5   : > { %2923 = vsyncadd (%p3770_p11), %s600_s14, 4294967168  ;;  %p3775_p5 = pmov %p3771_p3 }
  0xf6   : > { %p3776_p9 = pmov %p3771_p3 }
  0xf7   : > { %2925 = dma.done.wait (%p3775_p5), [#allocation6], 1024  }
  0xf8   : > { %2927 = vsyncadd (%p3776_p9), [#allocation6], 4294966272  ;;  %p3777_p2 = pmov %p3771_p3 }
  0xfa   : > { %2929 = dma.done.wait (%p3777_p2), [#allocation9], 1024   ;;  %p3778_p1 = pmov %p3777_p2 }
  0xfb   : > { %p693_p4 = scmp.lt.s32.totalorder %s3087_s22, 1  ;;  %v2973_v0 = vmov 0   ;;  %v2974_v1 = vmov 1983009808   ;;  %v878_v3 = vlaneseq  ;;  %v2500_v4 = vld [vmem:[#allocation8 + $0x4] ss:$16 sps:$4 sm:$0xff]  }
  0xfc   : > { %2931 = vsyncadd (%p3778_p1), [#allocation9], 4294966272  ;;  %814 = vmatprep.mubr.bf16.mxu0 %v2973_v0  ;;  %857 = vmatprep.mubr.bf16.mxu1 %v2973_v0  ;;  %v876_v2 = vunpack.c.l.s4 %v2974_v1  ;;  %v2502_v7 = vld [vmem:[#allocation8 + $0xc] ss:$16 sps:$4 sm:$0xff]   ;;  %v2504_v8 = vld [vmem:[#allocation8] ss:$16 sps:$4 sm:$0xff]  }
  0xfd   : > { %s3394_s24 = scalar_select %p693_p4, %s3087_s22, 1  ;;  %v879_v6 = vshrl.u32 %v878_v3, 7  ;;  %782 = vmatprep.subr.bf16.mxu0 %v2500_v4  ;;  %v2505_v9 = vld [vmem:[#allocation8 + $0x8] ss:$16 sps:$4 sm:$0xff]   ;;  %825 = vmatprep.subr.bf16.mxu1 %v2502_v7  ;;  %v2506_v10 = vld [vmem:[#allocation8 + $0x24] ss:$16 sps:$4 sm:$0xff]  }
  0xfe   : > { %v877_v5 = vunpack.c.0.s8 %v876_v2  ;;  %783 = vmatpush1.bf16.msra.mxu0 %v2504_v8  ;;  %826 = vmatpush1.bf16.msra.mxu1 %v2505_v9  ;;  %v2508_v11 = vld [vmem:[#allocation8 + $0x2c] ss:$16 sps:$4 sm:$0xff]   ;;  %v2510_v12 = vld [vmem:[#allocation8 + $0x20] ss:$16 sps:$4 sm:$0xff]   ;;  %s3779_s0 = sld [smem:[#allocation31_spill]]  ;;  %s3780_s2 = sld [smem:[#allocation33_spill]] }
  0xff   : > { %s2281_s28 = sshll.u32 %s3394_s24, 3  ;;  %784 = vmatprep.subr.bf16.mxu0 %v2506_v10  ;;  %v2511_v14 = vld [vmem:[#allocation8 + $0x28] ss:$16 sps:$4 sm:$0xff]   ;;  %827 = vmatprep.subr.bf16.mxu1 %v2508_v11  ;;  %vm778_vm0 = vcmask 261120   ;;  %vm895_vm1 = vcmask 1041408   ;;  %vm891_vm2 = vcmask 31744  }
 0x100   : > { %v880_v13 = vsub.s32 %v877_v5, %v879_v6  ;;  %v724_v16 = vld [vmem:[#allocation7] sm:$0xff]  ;;  %v2975_v25 = vmov 0.0   ;;  %vm2976_vm3 = vmmov 0   ;;  %s2977_s13 = smov 32   ;;  %v1223_v27 = vld [vmem:[%s586_s26 + $0x8] sm:$0xff]  ;;  %vm1003_vm4 = vcmask 130048  }
 0x101   : > { %v874_v18 = vcombine.high %v724_v16, %v724_v16  ;;  %v1222_v26 = vld [vmem:[%s586_s26] sm:$0xff]  ;;  %v3425_v41 = vld [vmem:[#allocation2 + $0x8] sm:$0xff]   ;;  %v3437_v42 = vld [vmem:[#allocation2 + $0x18] sm:$0xff]   ;;  %s3781_s26 = sld [smem:[#allocation36_spill]]  ;;  %s2978_s8 = smov 64  }
 0x102   : > { %785 = vmatpush1.bf16.msra.mxu0 %v2510_v12  ;;  %828 = vmatpush1.bf16.msra.mxu1 %v2511_v14  ;;  %v881_v17 = vrot.slane %v724_v16, %v880_v13  ;;  %v3423_v40 = vld [vmem:[#allocation2] sm:$0xff]   ;;  %v3439_v43 = vld [vmem:[#allocation2 + $0x10] sm:$0xff]   ;;  %s2283_s27 = sshll.u32 %s3394_s24, 4  ;;  %s3783_s23 = sld [smem:[#allocation37_spill]] }
 0x103   : > { %v888_v21 = vrot.slane %v874_v18, %v880_v13  ;;  %1226 = vrot.lane.b32.xlu1 %v1222_v26, %s2977_s13  ;;  %s2979_s24 = smov 96   ;;  %s3532_s3 = scalar_lea.vmem [#allocation13], %s3358_s30 }
 0x104   : > { %s697_s11 = scalar_lea.vmem %s3779_s0, %s2281_s28  ;;  %s702_s18 = scalar_lea.vmem %s3780_s2, %s2281_s28  ;;  %v889_v19 = vcombine.high %v881_v17, %v881_v17  ;;  %v897_v20 = vsel %vm895_vm1, %v881_v17, 0 }
 0x105   : > { %v2512_v15 = vld [vmem:[%s702_s18] sm:$0xff]   ;;  %v890_v22 = vcombine.high %v888_v21, %v888_v21  ;;  %v903_v23 = vsel %vm895_vm1, %v888_v21, 0  ;;  %s3782_s28 = sld [smem:[#allocation38_spill]]  ;;  %s678_s18 = scalar_lea.vmem [#allocation14], %s3358_s30 }
 0x106   : > { %2219 = vmatmul.mubr.msk.bf16.vlgmr.msra.gmra.mrb[0].mxu0 %vm778_vm0, %v2512_v15  ;;  %2220 = vmatmul.mubr.msk.bf16.vlgmr.msra.gmra.mrb[0].mxu1 %vm778_vm0, %v2512_v15  ;;  %v2514_v24 = vld [vmem:[%s697_s11] sm:$0xff]   ;;  %s1875_s12 = sshll.u32 %s678_s18, 4  ;;  %s3529_s12 = int_to_ptr.vmem [resolvable:$true] %s1875_s12 }
 0x107   : > { %2222 = vmatprep.subr.msk.bf16.mxu0 %vm895_vm1, %v889_v19  ;;  %940 = vmatprep.mubr.bf16.mxu0 %v2973_v0  ;;  %v2234_v60 = vld [vmem:[%s3781_s26] ss:$0 sm:$0xff]  ;;  %s1859_s26 = sshll.u32 %s3532_s3, 4  ;;  %s2776_s29 = scalar_lea.vmem %s3529_s12, 256  ;;  %s3545_s26 = int_to_ptr.vmem [resolvable:$true] %s1859_s26 }
 0x108   : > { %909 = vmatpush1.bf16.msra.mxu0 %v897_v20  ;;  %983 = vmatprep.mubr.bf16.mxu1 %v2973_v0  ;;  %s707_s15 = scalar_lea.vmem %s3783_s23, %s2283_s27  ;;  %s1836_s27 = scalar_lea.sflag [#allocation15], %s3352_s17 }
 0x109   : > { %2224 = vmatprep.subr.msk.bf16.mxu1 %vm895_vm1, %v890_v22  ;;  %2304 = vmatprep.subr.bf16.mxu0 %v2975_v25  ;;  %p2777_p0 = scmp.ne.s32.totalorder %s3529_s12, %s2776_s29 }
 0x10a   : > { %952 = vmatpush1.bf16.msra.mxu1 %v903_v23  ;;  %1228 = vrot.lane.b32.xlu1 %v1223_v27, %s2977_s13 }
 0x10b   : > { %2310 = vmatprep.subr.bf16.mxu1 %v2975_v25  ;;  %p2778_p12 = pnand %p2777_p0, %p3254_p6 }
 0x10d   : > { %p2779_p8 = pneg %p2778_p12 }
 0x112   : > { %2223 = vmatmul.mubr.msk.bf16.vlgmr.msra.gmra.mrb[0].mxu0 %vm891_vm2, %v2514_v24  ;;  %2225 = vmatmul.mubr.msk.bf16.vlgmr.msra.gmra.mrb[0].mxu1 %vm891_vm2, %v2514_v24 }
 0x113   : > { %2312 = vmatprep.mubr.msk.bf16.mxu1 %vm2976_vm3, %v2975_v25  ;;  %2306 = vmatprep.mubr.msk.bf16.mxu0 %vm2976_vm3, %v2975_v25 }
 0x175   : > { %v1227_v20 = vpop.permute.xlu1 %1226 }
 0x17c   : > { %v1229_v22 = vpop.permute.xlu1 %1228 }
 0x1e5   : > { %v942_v28 = vpop.f32.mrb[0].mxu0  ;;  %v985_v29 = vpop.f32.mrb[0].mxu1 }
 0x1e6   : > { %v944_v30 = vpop.f32.mrb[1].mxu0  ;;  %v987_v31 = vpop.f32.mrb[1].mxu1 }
 0x1e7   : > { %v946_v32 = vpop.f32.mrb[2].mxu0  ;;  %v989_v33 = vpop.f32.mrb[2].mxu1 }
 0x1e8   : > { %v994_v34 = vpack.c.bf16 %v946_v32, %v942_v28  ;;  %v996_v35 = vpack.c.bf16 %v989_v33, %v985_v29  ;;  %v948_v36 = vpop.f32.mrb[3].mxu0  ;;  %v991_v37 = vpop.f32.mrb[3].mxu1  ;;  %v2519_v29 = vld [vmem:[#allocation12] ss:$16 sps:$4 sm:$0xff]   ;;  %v2524_v32 = vld [vmem:[#allocation12 + $0xc] ss:$16 sps:$4 sm:$0xff]  }
 0x1e9   : > { %v995_v38 = vpack.c.bf16 %v948_v36, %v944_v30  ;;  %v997_v39 = vpack.c.bf16 %v991_v37, %v987_v31  ;;  %v2521_v30 = vld [vmem:[#allocation12 + $0x4] ss:$16 sps:$4 sm:$0xff]   ;;  %v2522_v31 = vld [vmem:[#allocation12 + $0x8] ss:$16 sps:$4 sm:$0xff]  }
 0x1ea   : > { %2311 = vmatpush3.bf16.msra.mxu1 %v994_v34  ;;  %v2527_v33 = vld [vmem:[#allocation12 + $0x24] ss:$16 sps:$4 sm:$0xff]   ;;  %v2530_v34 = vld [vmem:[#allocation12 + $0x2c] ss:$16 sps:$4 sm:$0xff]   ;;  %v2528_v37 = vld [vmem:[#allocation12 + $0x28] ss:$16 sps:$4 sm:$0xff]  }
 0x1eb   : > { %2305 = vmatpush3.bf16.msra.mxu0 %v995_v38  ;;  %2322 = vmatprep.subr.bf16.mxu1 %v2975_v25  ;;  %v2534_v38 = vld [vmem:[#allocation11 + $0x4] ss:$16 sps:$4 sm:$0xff]  }
 0x1ec   : > { %2316 = vmatprep.subr.bf16.mxu0 %v2975_v25 }
 0x1ed   : > { %2313 = vmatmul.mubr.msk.bf16.vlgmr.msra.gmra.mrb[4].mxu1 %vm1003_vm4, %v3423_v40 }
 0x1ee   : > { %2307 = vmatmul.mubr.msk.bf16.vlgmr.msra.gmra.mrb[4].mxu0 %vm1003_vm4, %v3425_v41  ;;  %2323 = vmatpush3.bf16.msra.mxu1 %v997_v39  ;;  %v2537_v39 = vld [vmem:[#allocation11 + $0xc] ss:$16 sps:$4 sm:$0xff]  }
 0x1ef   : > { %2317 = vmatpush3.bf16.msra.mxu0 %v996_v35  ;;  %2324 = vmatprep.mubr.msk.bf16.mxu1 %vm2976_vm3, %v2975_v25  ;;  %v2525_v35 = vld [vmem:[#allocation12 + $0x20] ss:$16 sps:$4 sm:$0xff]  }
 0x1f0   : > { %2318 = vmatprep.mubr.msk.bf16.mxu0 %vm2976_vm3, %v2975_v25  ;;  %1353 = vmatprep.subr.bf16.mxu0 %v2521_v30  ;;  %v1766_v30 = vld [vmem:[%s707_s15] sm:$0xff] }
 0x1f1   : > { %1396 = vmatprep.subr.bf16.mxu1 %v2524_v32  ;;  %v1767_v32 = vld [vmem:[%s707_s15 + $0x8] sm:$0xff] }
 0x1f5   : > { %2325 = vmatmul.mubr.msk.bf16.vlgmr.msra.gmra.mrb[8].mxu1 %vm1003_vm4, %v3437_v42 }
 0x1f6   : > { %2319 = vmatmul.mubr.msk.bf16.vlgmr.msra.gmra.mrb[8].mxu0 %vm1003_vm4, %v3439_v43  ;;  %1428 = vmatprep.mubr.bf16.mxu1 %v2973_v0 }
 0x1f7   : > { %1385 = vmatprep.mubr.bf16.mxu0 %v2973_v0  ;;  %1354 = vmatpush1.bf16.msra.mxu0 %v2519_v29 }
 0x1f8   : > { %1397 = vmatpush1.bf16.msra.mxu1 %v2522_v31  ;;  %1355 = vmatprep.subr.bf16.mxu0 %v2527_v33 }
 0x1f9   : > { %1398 = vmatprep.subr.bf16.mxu1 %v2530_v34 }
 0x1fb   : > { %1356 = vmatpush1.bf16.msra.mxu0 %v2525_v35 }
 0x1fc   : > { %1399 = vmatpush1.bf16.msra.mxu1 %v2528_v37  ;;  %1485 = vmatprep.subr.bf16.mxu0 %v2534_v38 }
 0x1fd   : > { %1528 = vmatprep.subr.bf16.mxu1 %v2537_v39 }
 0x2c0   : > { %v1090_v44 = vpop.f32.mrb[4].mxu1 }
 0x2c1   : > { %v1041_v45 = vpop.f32.mrb[4].mxu0  ;;  %v2314_v46 = vpop.f32.mrb[5].mxu1 }
 0x2c2   : > { %v1091_v47 = vadd.f32 %v1090_v44, %v1041_v45  ;;  %v2308_v48 = vpop.f32.mrb[5].mxu0  ;;  %v1093_v49 = vpop.f32.mrb[6].mxu1  ;;  %v2531_v44 = vld [vmem:[%s3376_s25] sm:$0xff]   ;;  %s3784_s25 = sld [smem:[#allocation40_spill]] }
 0x2c3   : > { %v1044_v50 = vpop.f32.mrb[6].mxu0  ;;  %v2315_v51 = vpop.f32.mrb[7].mxu1  ;;  %v2532_v45 = vld [vmem:[#allocation11] ss:$16 sps:$4 sm:$0xff]   ;;  %v2540_v48 = vld [vmem:[#allocation11 + $0x24] ss:$16 sps:$4 sm:$0xff]   ;;  %2246 = vmatmul.mubr.msk.bf16.vlgmr.msra.gmra.mrb[12].mxu0 %vm778_vm0, %v2531_v44  ;;  %2247 = vmatmul.mubr.msk.bf16.vlgmr.msra.gmra.mrb[12].mxu1 %vm778_vm0, %v2531_v44 }
 0x2c4   : > { %v1094_v52 = vadd.f32 %v1093_v49, %v1044_v50  ;;  %v2309_v53 = vpop.f32.mrb[7].mxu0  ;;  %v2543_v49 = vld [vmem:[#allocation11 + $0x2c] ss:$16 sps:$4 sm:$0xff]   ;;  %1486 = vmatpush1.bf16.msra.mxu0 %v2532_v45  ;;  %v2538_v50 = vld [vmem:[#allocation11 + $0x20] ss:$16 sps:$4 sm:$0xff]   ;;  %1517 = vmatprep.mubr.bf16.mxu0 %v2973_v0 }
 0x2c5   : > { %1487 = vmatprep.subr.bf16.mxu0 %v2540_v48  ;;  %v2541_v51 = vld [vmem:[#allocation11 + $0x28] ss:$16 sps:$4 sm:$0xff]   ;;  %1560 = vmatprep.mubr.bf16.mxu1 %v2973_v0 }
 0x2c8   : > { %v1190_v54 = vpop.f32.mrb[8].mxu1  ;;  %1488 = vmatpush1.bf16.msra.mxu0 %v2538_v50 }
 0x2c9   : > { %v1139_v55 = vpop.f32.mrb[8].mxu0  ;;  %v2326_v56 = vpop.f32.mrb[9].mxu1  ;;  %2328 = vmatprep.subr.bf16.mxu0 %v2975_v25 }
 0x2ca   : > { %v1146_v57 = vadd.f32 %v1139_v55, %v1091_v47  ;;  %v2320_v58 = vpop.f32.mrb[9].mxu0  ;;  %v1193_v59 = vpop.f32.mrb[10].mxu1  ;;  %v2535_v47 = vld [vmem:[#allocation11 + $0x8] ss:$16 sps:$4 sm:$0xff]  }
 0x2cb   : > { %v1142_v61 = vpop.f32.mrb[10].mxu0  ;;  %v2327_v62 = vpop.f32.mrb[11].mxu1  ;;  %1529 = vmatpush1.bf16.msra.mxu1 %v2535_v47 }
 0x2cc   : > { %v1197_v63 = vadd.f32 %v1190_v54, %v1146_v57  ;;  %v1147_v1 = vadd.f32 %v1142_v61, %v1094_v52  ;;  %v2321_v2 = vpop.f32.mrb[11].mxu0  ;;  %1530 = vmatprep.subr.bf16.mxu1 %v2543_v49 }
 0x2ce   : > { %v1206_v3 = vadd.f32 %v2234_v60, %v1197_v63  ;;  %v1198_v4 = vadd.f32 %v1193_v59, %v1147_v1 }
 0x2cf   : > { %1531 = vmatpush1.bf16.msra.mxu1 %v2541_v51 }
 0x2d0   : > { %2544 = vtanh.f32 %v1206_v3  ;;  %v1207_v5 = vadd.f32 %v2234_v60, %v1198_v4  ;;  %v2235_v8 = vmul.f32 -1.442695, %v1206_v3  ;;  %2334 = vmatprep.subr.bf16.mxu1 %v2975_v25 }
 0x2d2   : > { %2546 = vtanh.f32 %v1207_v5  ;;  %v2236_v9 = vmul.f32 -1.442695, %v1207_v5 }
 0x2d3   : > { %2548 = vpow2.f32 %v2235_v8 }
 0x2d4   : > { %2550 = vpow2.f32 %v2236_v9 }
 0x2da   : > { %v2545_v6 = vpop.eup %2544 }
 0x2db   : > { %1236 = vrot.lane.b32.xlu0 %v2545_v6, %s2977_s13 }
 0x2dc   : > { %v2547_v7 = vpop.eup %2546 }
 0x2dd   : > { %v2549_v10 = vpop.eup %2548 }
 0x2de   : > { %v1214_v11 = vadd.f32 1.0, %v2549_v10  ;;  %v2551_v12 = vpop.eup %2550 }
 0x2df   : > { %1238 = vrot.lane.b32.xlu0 %v2547_v7, %s2977_s13  ;;  %v1215_v13 = vadd.f32 1.0, %v2551_v12 }
 0x2e0   : > { %2552 = vrcp.f32 %v1214_v11 }
 0x2e1   : > { %2554 = vrcp.f32 %v1215_v13 }
 0x2ea   : > { %v3452_v14 = vpop.eup %2552 }
 0x2eb   : > { %v2555_v17 = vpop.eup %2554  ;;  %v1232_v21 = vmul.f32 %v3452_v14, %v1227_v20 }
 0x2ec   : > { %v1233_v26 = vmul.f32 %v2555_v17, %v1229_v22 }
 0x34d   : > { %v1237_v15 = vpop.permute.xlu0 %1236 }
 0x34e   : > { %v1242_v16 = vmul.f32 %v3452_v14, %v1237_v15 }
 0x350   : > { %1246 = vrot.lane.b32.xlu0 %v1242_v16, %s2977_s13 }
 0x351   : > { %v1239_v18 = vpop.permute.xlu0 %1238 }
 0x352   : > { %v1243_v19 = vmul.f32 %v2555_v17, %v1239_v18 }
 0x354   : > { %1248 = vrot.lane.b32.xlu1 %v1243_v19, %s2977_s13 }
 0x3c2   : > { %v1247_v23 = vpop.permute.xlu0 %1246 }
 0x3c3   : > { %v3458_v24 = vadd.f32 %v1247_v23, %v1232_v21 }
 0x3c5   : > { %2556 = vtanh.f32 %v3458_v24 }
 0x3c6   : > { %v1249_v27 = vpop.permute.xlu1 %1248 }
 0x3c7   : > { %v3461_v28 = vadd.f32 %v1249_v27, %v1233_v26 }
 0x3c9   : > { %2558 = vtanh.f32 %v3461_v28 }
 0x3cf   : > { %v2557_v36 = vpop.eup %2556 }
 0x3d0   : > { %1258 = vrot.lane.b32.xlu0 %v2557_v36, %s2977_s13 }
 0x3d3   : > { %v2559_v46 = vpop.eup %2558 }
 0x3d4   : > { %1260 = vrot.lane.b32.xlu1 %v2559_v46, %s2977_s13 }
 0x442   : > { %v1259_v52 = vpop.permute.xlu0 %1258 }
 0x443   : > { %v3474_v54 = vmul.f32 %v3452_v14, %v1259_v52 }
 0x446   : > { %v1261_v53 = vpop.permute.xlu1 %1260 }
 0x447   : > { %v3476_v55 = vmul.f32 %v2555_v17, %v1261_v53 }
 0x449   : > { %v1286_v56 = vpack.c.bf16 %v3476_v55, %v3474_v54 }
 0x44b   : > { %1440 = vrot.lane.b32.xlu0 %v1286_v56, %s2978_s8 }
 0x4bd   : > { %v1441_v0 = vpop.permute.xlu0 %1440 }
 0x4be   : > { %2256 = vmatmul.mubr.msk.bf16.vlgmr.msra.gmra.mrb[12].mxu0 %vm778_vm0, %v1441_v0  ;;  %2257 = vmatmul.mubr.msk.bf16.vlgmr.msra.gmra.mrb[12].mxu1 %vm778_vm0, %v1441_v0 }
 0x4bf   : > { %2330 = vmatprep.mubr.msk.bf16.mxu0 %vm2976_vm3, %v2975_v25  ;;  %2336 = vmatprep.mubr.msk.bf16.mxu1 %vm2976_vm3, %v2975_v25 }
 0x591   : > { %v1519_v57 = vpop.f32.mrb[12].mxu0  ;;  %v1562_v58 = vpop.f32.mrb[12].mxu1 }
 0x592   : > { %v1521_v59 = vpop.f32.mrb[13].mxu0  ;;  %v1564_v60 = vpop.f32.mrb[13].mxu1 }
 0x593   : > { %v1523_v61 = vpop.f32.mrb[14].mxu0  ;;  %v1566_v62 = vpop.f32.mrb[14].mxu1 }
 0x594   : > { %v1571_v63 = vpack.c.bf16 %v1523_v61, %v1519_v57  ;;  %v1573_v1 = vpack.c.bf16 %v1566_v62, %v1562_v58  ;;  %v1525_v2 = vpop.f32.mrb[15].mxu0  ;;  %v1568_v3 = vpop.f32.mrb[15].mxu1 }
 0x595   : > { %v1572_v4 = vpack.c.bf16 %v1525_v2, %v1521_v59  ;;  %v1574_v5 = vpack.c.bf16 %v1568_v3, %v1564_v60 }
 0x596   : > { %2335 = vmatpush3.bf16.msra.mxu1 %v1571_v63 }
 0x597   : > { %2329 = vmatpush3.bf16.msra.mxu0 %v1572_v4  ;;  %2346 = vmatprep.subr.bf16.mxu1 %v2975_v25 }
 0x598   : > { %2340 = vmatprep.subr.bf16.mxu0 %v2975_v25 }
 0x599   : > { %2337 = vmatmul.mubr.msk.bf16.vlgmr.msra.gmra.mrb[16].mxu1 %vm1003_vm4, %v3423_v40 }
 0x59a   : > { %2331 = vmatmul.mubr.msk.bf16.vlgmr.msra.gmra.mrb[16].mxu0 %vm1003_vm4, %v3425_v41  ;;  %2347 = vmatpush3.bf16.msra.mxu1 %v1574_v5 }
 0x59b   : > { %2341 = vmatpush3.bf16.msra.mxu0 %v1573_v1  ;;  %2342 = vmatprep.mubr.msk.bf16.mxu0 %vm2976_vm3, %v2975_v25 }
 0x59c   : > { %2348 = vmatprep.mubr.msk.bf16.mxu1 %vm2976_vm3, %v2975_v25 }
 0x5a1   : > { %2349 = vmatmul.mubr.msk.bf16.vlgmr.msra.gmra.mrb[20].mxu1 %vm1003_vm4, %v3437_v42 }
 0x5a2   : > { %2343 = vmatmul.mubr.msk.bf16.vlgmr.msra.gmra.mrb[20].mxu0 %vm1003_vm4, %v3439_v43  ;;  %v2262_v43 = vld [vmem:[%s3782_s28] ss:$0 sm:$0xff] }
 0x66c   : > { %v1650_v6 = vpop.f32.mrb[16].mxu1 }
 0x66d   : > { %v1609_v7 = vpop.f32.mrb[16].mxu0  ;;  %v2338_v40 = vpop.f32.mrb[17].mxu1 }
 0x66e   : > { %v2332_v8 = vpop.f32.mrb[17].mxu0  ;;  %v1651_v9 = vadd.f32 %v1650_v6, %v1609_v7  ;;  %v1653_v41 = vpop.f32.mrb[18].mxu1 }
 0x66f   : > { %v1612_v10 = vpop.f32.mrb[18].mxu0  ;;  %v2339_v11 = vpop.f32.mrb[19].mxu1 }
 0x670   : > { %v2333_v12 = vpop.f32.mrb[19].mxu0  ;;  %v1654_v13 = vadd.f32 %v1653_v41, %v1612_v10 }
 0x674   : > { %v1734_v14 = vpop.f32.mrb[20].mxu1 }
 0x675   : > { %v1691_v15 = vpop.f32.mrb[20].mxu0  ;;  %v2350_v25 = vpop.f32.mrb[21].mxu1 }
 0x676   : > { %v1698_v16 = vadd.f32 %v1691_v15, %v1651_v9  ;;  %v2344_v17 = vpop.f32.mrb[21].mxu0  ;;  %v1737_v42 = vpop.f32.mrb[22].mxu1 }
 0x677   : > { %v1694_v18 = vpop.f32.mrb[22].mxu0  ;;  %v2351_v19 = vpop.f32.mrb[23].mxu1 }
 0x678   : > { %v1699_v20 = vadd.f32 %v1694_v18, %v1654_v13  ;;  %v1741_v21 = vadd.f32 %v1734_v14, %v1698_v16  ;;  %v2345_v22 = vpop.f32.mrb[23].mxu0 }
 0x67a   : > { %v1750_v23 = vadd.f32 %v2262_v43, %v1741_v21  ;;  %v1742_v26 = vadd.f32 %v1737_v42, %v1699_v20 }
 0x67c   : > { %2560 = vtanh.f32 %v1750_v23  ;;  %v1751_v27 = vadd.f32 %v2262_v43, %v1742_v26  ;;  %v2263_v33 = vmul.f32 -1.442695, %v1750_v23 }
 0x67e   : > { %2562 = vtanh.f32 %v1751_v27  ;;  %v2264_v34 = vmul.f32 -1.442695, %v1751_v27 }
 0x67f   : > { %2564 = vpow2.f32 %v2263_v33 }
 0x680   : > { %2566 = vpow2.f32 %v2264_v34 }
 0x686   : > { %v2561_v29 = vpop.eup %2560 }
 0x687   : > { %1780 = vrot.lane.b32.xlu1 %v2561_v29, %s2977_s13 }
 0x688   : > { %v2563_v31 = vpop.eup %2562 }
 0x689   : > { %1782 = vrot.lane.b32.xlu0 %v2563_v31, %s2977_s13  ;;  %v2565_v35 = vpop.eup %2564 }
 0x68a   : > { %v2567_v36 = vpop.eup %2566  ;;  %v1758_v37 = vadd.f32 1.0, %v2565_v35 }
 0x68b   : > { %1770 = vrot.lane.b32.xlu1 %v1766_v30, %s2977_s13  ;;  %v1759_v38 = vadd.f32 1.0, %v2567_v36 }
 0x68c   : > { %2568 = vrcp.f32 %v1758_v37 }
 0x68d   : > { %1772 = vrot.lane.b32.xlu0 %v1767_v32, %s2977_s13  ;;  %2570 = vrcp.f32 %v1759_v38 }
 0x696   : > { %v2569_v39 = vpop.eup %2568 }
 0x697   : > { %v2571_v46 = vpop.eup %2570 }
 0x6f9   : > { %v1781_v44 = vpop.permute.xlu1 %1780 }
 0x6fa   : > { %v1786_v45 = vmul.f32 %v2569_v39, %v1781_v44 }
 0x6fb   : > { %v1783_v47 = vpop.permute.xlu0 %1782 }
 0x6fc   : > { %1790 = vrot.lane.b32.xlu1 %v1786_v45, %s2977_s13  ;;  %v1787_v48 = vmul.f32 %v2571_v46, %v1783_v47 }
 0x6fd   : > { %v1771_v49 = vpop.permute.xlu1 %1770 }
 0x6fe   : > { %1792 = vrot.lane.b32.xlu0 %v1787_v48, %s2977_s13  ;;  %v1776_v50 = vmul.f32 %v2569_v39, %v1771_v49 }
 0x6ff   : > { %v1773_v51 = vpop.permute.xlu0 %1772 }
 0x700   : > { %v1777_v56 = vmul.f32 %v2571_v46, %v1773_v51 }
 0x76e   : > { %v1791_v52 = vpop.permute.xlu1 %1790 }
 0x76f   : > { %v1796_v53 = vadd.f32 %v1791_v52, %v1776_v50 }
 0x770   : > { %v1793_v0 = vpop.permute.xlu0 %1792 }
 0x771   : > { %2572 = vtanh.f32 %v1796_v53  ;;  %v1797_v57 = vadd.f32 %v1793_v0, %v1777_v56 }
 0x773   : > { %2574 = vtanh.f32 %v1797_v57 }
 0x77b   : > { %v2573_v58 = vpop.eup %2572 }
 0x77c   : > { %1802 = vrot.lane.b32.xlu1 %v2573_v58, %s2977_s13 }
 0x77d   : > { %v2575_v59 = vpop.eup %2574 }
 0x77e   : > { %1804 = vrot.lane.b32.xlu0 %v2575_v59, %s2977_s13  ;;  %s3527_s13 = sshll.u32 %s3087_s22, 8 }
 0x77f   : > { %s3541_s28 = scalar_lea.hbm %s3784_s25, %s3527_s13 }
 0x780   : > { %1278 = vrot.lane.b32.xlu1 %v3458_v24, %s2979_s24 }
 0x782   : > { %1280 = vrot.lane.b32.xlu0 %v3461_v28, %s2979_s24 }
 0x784   : > { %1268 = vrot.lane.b32.xlu1 %v3474_v54, %s2978_s8 }
 0x786   : > { %1270 = vrot.lane.b32.xlu0 %v3476_v55, %s2978_s8 }
 0x7ee   : > { %v1803_v60 = vpop.permute.xlu1 %1802 }
 0x7ef   : > { %v1808_v61 = vmul.f32 %v2569_v39, %v1803_v60 }
 0x7f0   : > { %v1805_v62 = vpop.permute.xlu0 %1804 }
 0x7f1   : > { %1812 = vrot.lane.b32.xlu1 %v1808_v61, %s2978_s8  ;;  %v1809_v24 = vmul.f32 %v2571_v46, %v1805_v62 }
 0x7f2   : > { %v1279_v28 = vpop.permute.xlu1 %1278 }
 0x7f3   : > { %1284 = vst.msk [vmem:[%s678_s18] sm:$0xff] %vm778_vm0, %v1279_v28  ;;  %1814 = vrot.lane.b32.xlu0 %v1809_v24, %s2978_s8  ;;  %s2980_s8 = smov [#allocation14]  }
 0x7f4   : > { %v1281_v54 = vpop.permute.xlu0 %1280  ;;  %s2780_s11 = sshll.u32 %s2980_s8, 4  ;;  %s2781_s11 = int_to_ptr.vmem [resolvable:$false] %s2780_s11 }
 0x7f5   : > { %1822 = vrot.lane.b32.xlu1 %v1796_v53, %s2979_s24  ;;  %1285 = vst.msk [vmem:[%s678_s18 + $0x8] sm:$0xff] %vm778_vm0, %v1281_v54  ;;  %s2782_s23 = scalar_lea.vmem %s2781_s11, 512  ;;  %p2783_p11 = scmp.lt.s32.totalorder %s3529_s12, %s2781_s11 }
 0x7f6   : > { %v1269_v55 = vpop.permute.xlu1 %1268  ;;  %p2784_p3 = scmp.lt.s32.totalorder %s2782_s23, %s2776_s29 }
 0x7f7   : > { %1274 = vst.msk [vmem:[%s3532_s3] sm:$0xff] %vm778_vm0, %v1269_v55 }
 0x7f8   : > { %p2785_p7 = por %p2784_p3, %p2783_p11 }
 0x7fa   : > { %p2786_p10 = pnand %p2785_p7, %p2779_p8 }
 0x7fc   : > { %2789 = shalt.err (!%p2786_p10)
}
 0x7fd   : > { %s2790_s15 = scalar_lea.hbm %s3541_s28, 256  ;;  %s2794_s22 = scalar_lea.hbm %s3784_s25, 512 }
 0x7fe   : > { %p2791_p13 = scmp.ne.s32.totalorder %s3541_s28, %s2790_s15  ;;  %p2795_p2 = scmp.lt.u32.totalorder %s3541_s28, %s3784_s25 }
 0x7ff   : > { %p2796_p1 = scmp.lt.u32.totalorder %s2794_s22, %s2790_s15  ;;  %p2798_p0 = scmp.lt.u32.totalorder %s2790_s15, %s3541_s28 }
 0x800   : > { %p2792_p5 = pnand %p2791_p13, %p3254_p6 }
 0x801   : > { %p2797_p4 = por %p2796_p1, %p2795_p2 }
 0x802   : > { %p2793_p9 = pneg %p2792_p5 }
 0x803   : > { %p2799_p12 = por %p2798_p0, %p2797_p4 }
 0x805   : > { %p2800_p8 = pnand %p2799_p12, %p2793_p9 }
 0x807   : > { %2803 = shalt.err (!%p2800_p8)
}
 0x808   : > { %s2981_s29 = smov 128   ;;  %s2982_s23 = smov 8   ;;  %1824 = vrot.lane.b32.xlu0 %v1797_v57, %s2979_s24  ;;  %v1271_v63 = vpop.permute.xlu0 %1270 }
 0x809   : > { %2393 = dma.vmem_to_hbm [thread:$0]  (%p3254_p6), %s3529_s12, 256, %s3541_s28, %s1836_s27, %s2981_s29, %s2981_s29, %s2982_s23  }
 0x80a   : > { %s3785_s14 = sld [smem:[#allocation39_spill]]  ;;  %1275 = vst.msk [vmem:[%s3532_s3 + $0x8] sm:$0xff] %vm778_vm0, %v1271_v63  ;;  %s1831_s8 = scalar_lea.sflag [#allocation4], %s3355_s4 }
 0x80b   : > { %s2804_s11 = scalar_lea.vmem %s3545_s26, 256  ;;  %s2983_s0 = smov [#allocation13]  }
 0x80c   : > { %p2805_p11 = scmp.ne.s32.totalorder %s3545_s26, %s2804_s11  ;;  %s2808_s2 = sshll.u32 %s2983_s0, 4  ;;  %s2809_s2 = int_to_ptr.vmem [resolvable:$false] %s2808_s2 }
 0x80d   : > { %s2810_s12 = scalar_lea.vmem %s2809_s2, 512  ;;  %p2811_p10 = scmp.lt.s32.totalorder %s3545_s26, %s2809_s2 }
 0x80e   : > { %p2806_p3 = pnand %p2805_p11, %p3254_p6  ;;  %p2812_p13 = scmp.lt.s32.totalorder %s2810_s12, %s2804_s11 }
 0x810   : > { %s3581_s22 = scalar_lea.hbm %s3785_s14, %s3527_s13  ;;  %p2807_p7 = pneg %p2806_p3 }
 0x811   : > { %p2813_p5 = por %p2812_p13, %p2811_p10 }
 0x813   : > { %p2814_p9 = pnand %p2813_p5, %p2807_p7 }
 0x815   : > { %2817 = shalt.err (!%p2814_p9)
}
 0x816   : > { %s2818_s24 = scalar_lea.hbm %s3581_s22, 256  ;;  %s2822_s0 = scalar_lea.hbm %s3785_s14, 512 }
 0x817   : > { %p2819_p2 = scmp.ne.s32.totalorder %s3581_s22, %s2818_s24  ;;  %p2823_p0 = scmp.lt.u32.totalorder %s3581_s22, %s3785_s14 }
 0x818   : > { %p2824_p12 = scmp.lt.u32.totalorder %s2822_s0, %s2818_s24  ;;  %p2826_p11 = scmp.lt.u32.totalorder %s2818_s24, %s3581_s22 }
 0x819   : > { %p2820_p1 = pnand %p2819_p2, %p3254_p6 }
 0x81a   : > { %p2825_p8 = por %p2824_p12, %p2823_p0 }
 0x81b   : > { %p2821_p4 = pneg %p2820_p1 }
 0x81c   : > { %p2827_p3 = por %p2826_p11, %p2825_p8 }
 0x81e   : > { %p2828_p7 = pnand %p2827_p3, %p2821_p4 }
 0x820   : > { %2831 = shalt.err (!%p2828_p7)
}
 0x821   : > { %2392 = dma.vmem_to_hbm [thread:$0]  (%p3254_p6), %s3545_s26, 256, %s3581_s22, %s1831_s8, %s2981_s29, %s2981_s29, %s2982_s23  }
 0x822   : > { %s685_s18 = scalar_lea.vmem [#allocation16], %s3358_s30  ;;  %s3615_s12 = scalar_lea.vmem [#allocation17], %s3358_s30 }
 0x823   : > { %s1891_s11 = sshll.u32 %s685_s18, 4  ;;  %s1907_s24 = sshll.u32 %s3615_s12, 4  ;;  %s3618_s11 = int_to_ptr.vmem [resolvable:$true] %s1891_s11  ;;  %s3627_s24 = int_to_ptr.vmem [resolvable:$true] %s1907_s24 }
 0x824   : > { %s3786_s0 = sld [smem:[#allocation41_spill]]  ;;  %s2832_s30 = scalar_lea.vmem %s3618_s11, 256 }
 0x825   : > { %p2833_p10 = scmp.ne.s32.totalorder %s3618_s11, %s2832_s30  ;;  %s2984_s22 = smov [#allocation16]  }
 0x826   : > { %s2836_s8 = sshll.u32 %s2984_s22, 4  ;;  %s2837_s8 = int_to_ptr.vmem [resolvable:$false] %s2836_s8 }
 0x827   : > { %p2834_p13 = pnand %p2833_p10, %p3254_p6  ;;  %s2838_s15 = scalar_lea.vmem %s2837_s8, 512 }
 0x828   : > { %p2839_p9 = scmp.lt.s32.totalorder %s3618_s11, %s2837_s8  ;;  %p2840_p2 = scmp.lt.s32.totalorder %s2838_s15, %s2832_s30 }
 0x829   : > { %p2835_p5 = pneg %p2834_p13 }
 0x82a   : > { %s3624_s26 = scalar_lea.hbm %s3786_s0, %s3527_s13  ;;  %p2841_p1 = por %p2840_p2, %p2839_p9 }
 0x82c   : > { %p2842_p4 = pnand %p2841_p1, %p2835_p5 }
 0x863   : > { %v1813_v1 = vpop.permute.xlu1 %1812 }
 0x864   : > { %1818 = vst.msk [vmem:[%s685_s18] sm:$0xff] %vm778_vm0, %v1813_v1 }
 0x865   : > { %v1815_v2 = vpop.permute.xlu0 %1814 }
 0x866   : > { %1819 = vst.msk [vmem:[%s685_s18 + $0x8] sm:$0xff] %vm778_vm0, %v1815_v2 }
 0x867   : > { %v1823_v3 = vpop.permute.xlu1 %1822 }
 0x868   : > { %1828 = vst.msk [vmem:[%s3615_s12] sm:$0xff] %vm778_vm0, %v1823_v3 }
 0x869   : > { %2845 = shalt.err (!%p2842_p4)
}
 0x86a   : > { %s2846_s2 = scalar_lea.hbm %s3624_s26, 256  ;;  %s2850_s28 = scalar_lea.hbm %s3786_s0, 512 }
 0x86b   : > { %p2847_p0 = scmp.ne.s32.totalorder %s3624_s26, %s2846_s2  ;;  %p2851_p11 = scmp.lt.u32.totalorder %s3624_s26, %s3786_s0 }
 0x86c   : > { %p2852_p3 = scmp.lt.u32.totalorder %s2850_s28, %s2846_s2  ;;  %p2854_p10 = scmp.lt.u32.totalorder %s2846_s2, %s3624_s26 }
 0x86d   : > { %p2848_p12 = pnand %p2847_p0, %p3254_p6 }
 0x86e   : > { %p2853_p7 = por %p2852_p3, %p2851_p11 }
 0x86f   : > { %p2849_p8 = pneg %p2848_p12 }
 0x870   : > { %p2855_p13 = por %p2854_p10, %p2853_p7 }
 0x872   : > { %p2856_p5 = pnand %p2855_p13, %p2849_p8 }
 0x874   : > { %2859 = shalt.err (!%p2856_p5)
}
 0x875   : > { %2394 = dma.vmem_to_hbm [thread:$0]  (%p3254_p6), %s3618_s11, 256, %s3624_s26, %s1836_s27, %s2981_s29, %s2981_s29, %s2982_s23  }
 0x876   : > { %s3787_s2 = sld [smem:[#allocation42_spill]]  ;;  %s1846_s3 = scalar_lea.sflag [#allocation18], %s3355_s4 }
 0x877   : > { %s2860_s17 = scalar_lea.vmem %s3627_s24, 256  ;;  %s2985_s28 = smov [#allocation17]  }
 0x878   : > { %p2861_p9 = scmp.ne.s32.totalorder %s3627_s24, %s2860_s17  ;;  %s2864_s22 = sshll.u32 %s2985_s28, 4  ;;  %s2865_s22 = int_to_ptr.vmem [resolvable:$false] %s2864_s22 }
 0x879   : > { %s2866_s8 = scalar_lea.vmem %s2865_s22, 512  ;;  %p2867_p4 = scmp.lt.s32.totalorder %s3627_s24, %s2865_s22 }
 0x87a   : > { %v1825_v4 = vpop.permute.xlu0 %1824  ;;  %p2862_p2 = pnand %p2861_p9, %p3254_p6  ;;  %p2868_p0 = scmp.lt.s32.totalorder %s2866_s8, %s2860_s17 }
 0x87b   : > { %1829 = vst.msk [vmem:[%s3615_s12 + $0x8] sm:$0xff] %vm778_vm0, %v1825_v4 }
 0x87c   : > { %s3661_s18 = scalar_lea.hbm %s3787_s2, %s3527_s13  ;;  %p2863_p1 = pneg %p2862_p2 }
 0x87d   : > { %p2869_p12 = por %p2868_p0, %p2867_p4 }
 0x87f   : > { %p2870_p8 = pnand %p2869_p12, %p2863_p1 }
 0x881   : > { %2873 = shalt.err (!%p2870_p8)
}
 0x882   : > { %s2874_s13 = scalar_lea.hbm %s3661_s18, 256  ;;  %s2878_s12 = scalar_lea.hbm %s3787_s2, 512 }
 0x883   : > { %p2875_p11 = scmp.ne.s32.totalorder %s3661_s18, %s2874_s13  ;;  %p2879_p10 = scmp.lt.u32.totalorder %s3661_s18, %s3787_s2 }
 0x884   : > { %p2880_p13 = scmp.lt.u32.totalorder %s2878_s12, %s2874_s13  ;;  %p2882_p9 = scmp.lt.u32.totalorder %s2874_s13, %s3661_s18 }
 0x885   : > { %p2876_p3 = pnand %p2875_p11, %p3254_p6 }
 0x886   : > { %p2881_p5 = por %p2880_p13, %p2879_p10 }
 0x887   : > { %p2877_p7 = pneg %p2876_p3 }
 0x888   : > { %p2883_p2 = por %p2882_p9, %p2881_p5 }
 0x88a   : > { %p2884_p1 = pnand %p2883_p2, %p2877_p7 }
 0x88c   : > { %2887 = shalt.err (!%p2884_p1)
}
 0x88d   : > { %2395 = dma.vmem_to_hbm [thread:$0]  (%p3254_p6), %s3627_s24, 256, %s3661_s18, %s1846_s3, %s2981_s29, %s2981_s29, %s2982_s23  }
 0x88e PF: > { %s3788_s15 = sld [smem:[#allocation29_spill]]  ;;  %s3789_s17 = sld [smem:[#allocation30_spill]] }
 0x88f   : > { %p3791_p0 = scmp.ge.s32.totalorder %s2958_s21, 2 }
 0x894   : > { %s1922_s28 = sand.u32 1, %s3788_s15   ;;  %p3790_p4 = scmp.ne.s32.totalorder %s3789_s17, 0 }
 0x895   : > { %s1923_s22 = scalar_lea.sflag [#allocation4], %s1922_s28 }
 0x896   : > { %p2424_p12 = pnand %p3791_p0, %p3790_p4 }
 0x898   : > { %2933 = dma.done.wait (!%p2424_p12), %s1923_s22, 256  }
 0x899   : > { %2935 = vsyncadd (!%p2424_p12), %s1923_s22, 4294967040  ;;  %s3792_s6 = sadd.s32 4294967294, %s2958_s21  }
 0x89a   : > { %s1931_s8 = sand.u32 1, %s3792_s6  }
 0x89b   : > { %s1932_s13 = scalar_lea.sflag [#allocation15], %s1931_s8 }
 0x89c   : > { %2937 = dma.done.wait (!%p2424_p12), %s1932_s13, 512  }
 0x89d   : > { %2939 = vsyncadd (!%p2424_p12), %s1932_s13, 4294966784  ;;  %s1950_s4 = scalar_lea.sflag [#allocation18], %s1922_s28 }
 0x89e   : > { %2941 = dma.done.wait (!%p2424_p12), %s1950_s4, 256  }
 0x89f   : > { %2943 = vsyncadd (!%p2424_p12), %s1950_s4, 4294967040  ;;  %p37_p6 = scmp.ge.s32.totalorder %s3240_s16, 4   ;;  %s3793_s18 = smov %s2950_s19 }
 0x8a0   : > { %s3794_s19 = smov %s2954_s20  ;;  %s3795_s20 = smov %s3250_s1 }
 0x8a1   : > { %s3796_s21 = smov %s3240_s16  ;;  %39 = sbr.rel (!%p37_p6) target bundleno = 24 (0x18), region = 206 }
 0x8a8   :  { %1955 = vsyncpa [#allocation3], 1 }
 0x8a9   :  { %1957 = vsyncpa [#allocation3 + $0x1], 1 }
 0x8aa   :  { %1958 = vsyncpa [#allocation6], 1 }
 0x8ab   :  { %1960 = vsyncpa [#allocation6 + $0x1], 1 }
 0x8ac   :  { %1961 = vsyncpa [#allocation9], 1 }
 0x8ad   :  { %1962 = vsyncpa [#allocation4], 1 }
 0x8ae   :  { %1964 = vsyncpa [#allocation4 + $0x1], 1 }
 0x8af   :  { %1965 = vsyncpa [#allocation15], 1 }
 0x8b0   :  { %1967 = vsyncpa [#allocation15 + $0x1], 1 }
 0x8b1   :  { %1968 = vsyncpa [#allocation18], 1 }
 0x8b2   :  { %1970 = vsyncpa [#allocation18 + $0x1], 1 }

</bundles_post_ra>
